<compile_context>
chip_gen: v7x
topology: tpu7x:2x2x1
jax: 0.10.0
libtpu: 0.0.40
codegen_flags: <defaults>
</compile_context>

<pallas_src>
import functools
import math

import jax
import jax.numpy as jnp
from jax.experimental import pallas as pl
from jax.experimental.pallas import tpu as pltpu

# Explicit VMEM budget: safe on v5e/v6e (128 MiB physical) and v7x (64 MiB physical).
VMEM_LIMIT = 32 * 1024 * 1024
LN_EPS = 1e-5
TOKEN_TILE = 16          # token-axis tile (multiple of bf16 sublane packing)


def _round_up(x, m):
    return ((x + m - 1) // m) * m


def _layernorm(h, g, b):
    # h: (rows, E) f32; g,b: (1, E). eps = 1e-5 (PyTorch default), stats in f32.
    mean = jnp.mean(h, axis=-1, keepdims=True)
    c = h - mean
    var = jnp.mean(c * c, axis=-1, keepdims=True)
    inv = jax.lax.rsqrt(var + LN_EPS)
    return c * inv * g + b


def _gelu_exact(x):
    # Exact GELU 0.5*x*(1+erf(x/sqrt(2))); erf via A&S 7.1.26 polynomial (|err| < 1.5e-7).
    z = x * 0.7071067811865476
    az = jnp.abs(z)
    t = 1.0 / (1.0 + 0.3275911 * az)
    poly = t * (0.254829592 + t * (-0.284496736 + t * (1.421413741 +
                t * (-1.453152027 + t * 1.061405429))))
    erf_abs = 1.0 - poly * jnp.exp(-az * az)
    erf = jnp.where(z >= 0, erf_abs, -erf_abs)
    return 0.5 * x * (1.0 + erf)


# ------------------- fused patch embedding (matmul + cls/pos "base" add) -------------------

def _embed_kernel(p_ref, w_ref, base_ref, o_ref):
    # p_ref: (S_pad, patch_dim) bf16 (row 0 & tail are zeros), w_ref: (patch_dim, E) bf16,
    # base_ref: (S_pad, E) f32 = [cls+pos0 ; proj_b+pos_i ; 0].  out bf16.
    o_ref[...] = (jnp.dot(p_ref[...], w_ref[...], preferred_element_type=jnp.float32)
                  + base_ref[...]).astype(o_ref.dtype)


def embed_block(patches_flat, proj_w, base, bs, s_pad, embed_dim):
    patch_dim = patches_flat.shape[1]
    return pl.pallas_call(
        _embed_kernel,
        out_shape=jax.ShapeDtypeStruct((bs * s_pad, embed_dim), jnp.bfloat16),
        grid=(bs,),
        in_specs=[
            pl.BlockSpec((s_pad, patch_dim), lambda b: (b, 0)),
            pl.BlockSpec((patch_dim, embed_dim), lambda b: (0, 0)),
            pl.BlockSpec((s_pad, embed_dim), lambda b: (0, 0)),
        ],
        out_specs=pl.BlockSpec((s_pad, embed_dim), lambda b: (b, 0)),
        compiler_params=pltpu.CompilerParams(
            dimension_semantics=("parallel",),
            vmem_limit_bytes=VMEM_LIMIT),
    )(patches_flat, proj_w, base)


# -------------- fully fused encoder layer (QKV + MHA + proj + LN1 + MLP + LN2) --------------

def _encoder_layer_kernel(x_ref, win_ref, bin_ref, wout_ref, bout_ref, blk_ref,
                          g1_ref, b1_ref, w1_ref, fb1_ref, w2_ref, fb2_ref,
                          g2_ref, b2_ref, o_ref, *, scale):
    # x block: (L, tn, E) bf16.  Attention mixes over the L axis (torch batch_first=False
    # quirk); each of the tn token rows is an independent attention "batch" element.
    L, tn, E = x_ref.shape

    # Stack the L batch slices into one (L*tn, E) LHS -> single MXU-filling matmuls.
    x = jnp.concatenate([x_ref[i] for i in range(L)], axis=0)          # (L*tn, E) bf16
    xf = x.astype(jnp.float32)

    qkv = jnp.dot(x, win_ref[...], preferred_element_type=jnp.float32) + bin_ref[...]
    q = qkv[:, :E] * scale
    k = qkv[:, E:2 * E]
    v = qkv[:, 2 * E:]
    blk = blk_ref[...]                                                 # (E,E) head block-diag

    attn_parts = []
    for i in range(L):
        qi = q[i * tn:(i + 1) * tn]
        # Per-head scores replicated across each head's Dh lanes: (q*k) @ block-diag(ones).
        # Keeps E on the lane axis end-to-end; no head transposes/reshapes.
        s = [jnp.dot((qi * k[j * tn:(j + 1) * tn]).astype(jnp.bfloat16), blk,
                     preferred_element_type=jnp.float32) for j in range(L)]
        m = s[0]
        for j in range(1, L):
            m = jnp.maximum(m, s[j])
        denom = jnp.zeros_like(m)
        acc = jnp.zeros_like(qi)
        for j in range(L):
            pj = jnp.exp(s[j] - m)          # replicated per head block -> per-head softmax
            denom = denom + pj
            acc = acc + pj * v[j * tn:(j + 1) * tn]
        attn_parts.append(acc * pl.reciprocal(denom, approx=False))
    attn = jnp.concatenate(attn_parts, axis=0)                         # (L*tn, E) f32

    proj = jnp.dot(attn.astype(jnp.bfloat16), wout_ref[...],
                   preferred_element_type=jnp.float32) + bout_ref[...]
    h1 = _layernorm(xf + proj, g1_ref[...], b1_ref[...])               # LN1(x + attn)

    h = jnp.dot(h1.astype(jnp.bfloat16), w1_ref[...],
                preferred_element_type=jnp.float32) + fb1_ref[...]
    h = _gelu_exact(h)
    h = jnp.dot(h.astype(jnp.bfloat16), w2_ref[...],
                preferred_element_type=jnp.float32) + fb2_ref[...]
    h2 = _layernorm(h1 + h, g2_ref[...], b2_ref[...])                  # LN2(h1 + mlp)

    out = h2.astype(o_ref.dtype)
    for i in range(L):
        o_ref[i] = out[i * tn:(i + 1) * tn]


def encoder_layer(x, p, num_heads, blkdiag):
    """Full encoder layer:  LN2( y + MLP(y) ),  y = LN1( x + MHA(x) ).   x: (L, S_pad, E) bf16."""
    L, s_pad, E = x.shape
    MLP = p["fc1_w"].shape[1]
    tn = TOKEN_TILE if s_pad % TOKEN_TILE == 0 else 8
    scale = 1.0 / math.sqrt(E // num_heads)
    kern = functools.partial(_encoder_layer_kernel, scale=scale)
    return pl.pallas_call(
        kern,
        out_shape=jax.ShapeDtypeStruct((L, s_pad, E), jnp.bfloat16),
        grid=(s_pad // tn,),
        in_specs=[
            pl.BlockSpec((L, tn, E), lambda t: (0, t, 0)),
            pl.BlockSpec((E, 3 * E), lambda t: (0, 0)),
            pl.BlockSpec((1, 3 * E), lambda t: (0, 0)),
            pl.BlockSpec((E, E), lambda t: (0, 0)),
            pl.BlockSpec((1, E), lambda t: (0, 0)),
            pl.BlockSpec((E, E), lambda t: (0, 0)),
            pl.BlockSpec((1, E), lambda t: (0, 0)),
            pl.BlockSpec((1, E), lambda t: (0, 0)),
            pl.BlockSpec((E, MLP), lambda t: (0, 0)),
            pl.BlockSpec((1, MLP), lambda t: (0, 0)),
            pl.BlockSpec((MLP, E), lambda t: (0, 0)),
            pl.BlockSpec((1, E), lambda t: (0, 0)),
            pl.BlockSpec((1, E), lambda t: (0, 0)),
            pl.BlockSpec((1, E), lambda t: (0, 0)),
        ],
        out_specs=pl.BlockSpec((L, tn, E), lambda t: (0, t, 0)),
        compiler_params=pltpu.CompilerParams(
            dimension_semantics=("parallel",),
            vmem_limit_bytes=VMEM_LIMIT),
    )(x, p["in_w"], p["in_b"].reshape(1, 3 * E), p["out_w"], p["out_b"].reshape(1, E),
      blkdiag, p["ln1_g"].reshape(1, E), p["ln1_b"].reshape(1, E),
      p["fc1_w"], p["fc1_b"].reshape(1, MLP), p["fc2_w"], p["fc2_b"].reshape(1, E),
      p["ln2_g"].reshape(1, E), p["ln2_b"].reshape(1, E))


# --------------------- fused classification head (LN + padded linear) ---------------------

def _head_kernel(x_ref, g_ref, b_ref, w_ref, bias_ref, o_ref):
    h = _layernorm(x_ref[...].astype(jnp.float32), g_ref[...], b_ref[...])
    o_ref[...] = (jnp.dot(h.astype(jnp.bfloat16), w_ref[...],
                          preferred_element_type=jnp.float32) + bias_ref[...]
                  ).astype(o_ref.dtype)


def head_block(cls_out, params):
    M, E = cls_out.shape
    NCp = params["head_w_pad"].shape[1]      # lane-dense (multiple of 128) output
    return pl.pallas_call(
        _head_kernel,
        out_shape=jax.ShapeDtypeStruct((M, NCp), jnp.float32),
        grid=(1,),
        in_specs=[
            pl.BlockSpec((M, E), lambda i: (0, 0)),
            pl.BlockSpec((1, E), lambda i: (0, 0)),
            pl.BlockSpec((1, E), lambda i: (0, 0)),
            pl.BlockSpec((E, NCp), lambda i: (0, 0)),
            pl.BlockSpec((1, NCp), lambda i: (0, 0)),
        ],
        out_specs=pl.BlockSpec((M, NCp), lambda i: (0, 0)),
        compiler_params=pltpu.CompilerParams(vmem_limit_bytes=VMEM_LIMIT),
    )(cls_out, params["head_ln_g"].reshape(1, E), params["head_ln_b"].reshape(1, E),
      params["head_w_pad"], params["head_b_pad"].reshape(1, NCp))


# ----------------------------------- model forward -----------------------------------

def vit_forward(x, params, cfg):
    bs, C, H, W = x.shape
    P = cfg["patch_size"]
    assert H == W == cfg["img_size"]
    nH, nW = H // P, W // P
    nP = nH * nW
    E = cfg["embed_dim"]
    Dh = E // cfg["num_heads"]
    seq = nP + 1
    s_pad = _round_up(seq, TOKEN_TILE)       # aligned tiles + >=2 token grid steps (megacore)

    # torch: x.unfold(2,P,P).unfold(3,P,P).contiguous().view(bs, -1, C*P*P)  (exact C-order)
    patches = x.reshape(bs, C, nH, P, nW, P).transpose(0, 1, 2, 4, 3, 5)
    patches = patches.reshape(bs, nP, C * P * P)
    # row 0 reserved for the cls token, trailing rows are zero padding; carried in bf16.
    patches_pad = jnp.pad(patches, ((0, 0), (1, s_pad - nP - 1), (0, 0))).astype(jnp.bfloat16)
    patches_flat = patches_pad.reshape(bs * s_pad, C * P * P)

    # Per-row "base" tile folded into the embed kernel:
    #   row 0       -> class_token + pos_embed[0]
    #   rows 1..nP  -> proj_b + pos_embed[1..nP]
    #   tail        -> 0 (padding rows)
    row0 = (params["class_token"][0, 0] + params["pos_embed"][0, 0])[None, :]
    body = params["proj_b"][None, :] + params["pos_embed"][0, 1:seq]
    tail = jnp.zeros((s_pad - seq, E), jnp.float32)
    base = jnp.concatenate([row0, body, tail], axis=0)

    emb = embed_block(patches_flat, params["proj_w"], base, bs, s_pad, E)
    emb = emb.reshape(bs, s_pad, E)
    # top-level Dropout(0.1): identity at inference

    # head-block-diagonal ones matrix used by the in-kernel per-head score reduction
    head_ids = jnp.arange(E, dtype=jnp.int32) // Dh
    blkdiag = (head_ids[:, None] == head_ids[None, :]).astype(jnp.bfloat16)

    for lp in params["layers"]:
        emb = encoder_layer(emb, lp, cfg["num_heads"], blkdiag)

    cls_out = emb[:, 0]                                        # (bs, E) bf16
    logits = head_block(cls_out, params)[:, :cfg["num_classes"]]
    return logits


# ----------------------------------- parameter init -----------------------------------

def init_params(key, cfg):
    E, MLP, NC, D = cfg["embed_dim"], cfg["mlp_dim"], cfg["num_classes"], cfg["depth"]
    patch_dim = cfg["in_channels"] * cfg["patch_size"] ** 2
    num_patches = (cfg["img_size"] // cfg["patch_size"]) ** 2
    NCp = 128 * pl.cdiv(NC, 128)

    keys = iter(jax.random.split(key, 256))

    def wmat(shape, scale=0.02):        # matmul weights stored in bf16 (halves weight DMA)
        return (scale * jax.random.normal(next(keys), shape, jnp.float32)).astype(jnp.bfloat16)

    def wf32(shape, scale=1.0):
        return scale * jax.random.normal(next(keys), shape, jnp.float32)

    head_w = 0.02 * jax.random.normal(next(keys), (E, NC), jnp.float32)
    params = {
        "proj_w": wmat((patch_dim, E)),
        "proj_b": jnp.zeros((E,), jnp.float32),
        "class_token": wf32((1, 1, E)),
        "pos_embed": wf32((1, num_patches + 1, E)),
        "head_ln_g": jnp.ones((E,), jnp.float32),
        "head_ln_b": jnp.zeros((E,), jnp.float32),
        "head_w_pad": jnp.pad(head_w, ((0, 0), (0, NCp - NC))).astype(jnp.bfloat16),
        "head_b_pad": jnp.zeros((NCp,), jnp.float32),
        "layers": [],
    }
    for _ in range(D):
        params["layers"].append({
            "in_w": wmat((E, 3 * E)),
            "in_b": jnp.zeros((3 * E,), jnp.float32),
            "out_w": wmat((E, E)),
            "out_b": jnp.zeros((E,), jnp.float32),
            "ln1_g": jnp.ones((E,), jnp.float32),
            "ln1_b": jnp.zeros((E,), jnp.float32),
            "fc1_w": wmat((E, MLP)),
            "fc1_b": jnp.zeros((MLP,), jnp.float32),
            "fc2_w": wmat((MLP, E)),
            "fc2_b": jnp.zeros((E,), jnp.float32),
            "ln2_g": jnp.ones((E,), jnp.float32),
            "ln2_b": jnp.zeros((E,), jnp.float32),
        })
    return params


# ----------------------------------------- main -----------------------------------------

if __name__ == "__main__":
    # Small configuration consistent with the module's forward (scaled-down img_size).
    cfg = dict(img_size=32, patch_size=8, in_channels=3, embed_dim=128,
               num_heads=4, num_classes=10, depth=2, mlp_dim=128)

    key = jax.random.PRNGKey(0)
    pkey, xkey = jax.random.split(key)
    params = init_params(pkey, cfg)

    batch = 2
    x = jax.random.normal(
        xkey, (batch, cfg["in_channels"], cfg["img_size"], cfg["img_size"]), jnp.float32)

    fwd = jax.jit(lambda inp: vit_forward(inp, params, cfg))
    logits = fwd(x)
    jax.block_until_ready(logits)

    assert logits.shape == (batch, cfg["num_classes"])
    assert bool(jnp.all(jnp.isfinite(logits)))
    print("KERNEL_OK")
</pallas_src>

<mosaic_0001>
module attributes {stable_mosaic.version = 11 : i64} {
  func.func @_embed_kernel(%arg0: i32, %arg1: memref<32x192xbf16, #tpu.memory_space<vmem>>, %arg2: memref<192x128xbf16, #tpu.memory_space<vmem>>, %arg3: memref<32x128xf32, #tpu.memory_space<vmem>>, %arg4: memref<32x128xbf16, #tpu.memory_space<vmem>>) attributes {dimension_semantics = [#tpu.dimension_semantics<parallel>], iteration_bounds = array<i64: 2>, scalar_prefetch = 0 : i64, scratch_operands = 0 : i64, tpu.core_type = #tpu.core_type<tc>, window_params = [{transform_indices = @transform_0, window_bounds = array<i64: 32, 192>}, {pipeline_mode = #tpu.pipeline_mode<synchronous>, transform_indices = @transform_1, window_bounds = array<i64: 192, 128>}, {pipeline_mode = #tpu.pipeline_mode<synchronous>, transform_indices = @transform_2, window_bounds = array<i64: 32, 128>}, {transform_indices = @transform_3, window_bounds = array<i64: 32, 128>}]} {
    %c0 = arith.constant 0 : index
    %c0_0 = arith.constant 0 : index
    %0 = vector.load %arg1[%c0, %c0_0] : memref<32x192xbf16, #tpu.memory_space<vmem>>, vector<32x192xbf16>
    %c0_1 = arith.constant 0 : index
    %c0_2 = arith.constant 0 : index
    %1 = vector.load %arg2[%c0_1, %c0_2] : memref<192x128xbf16, #tpu.memory_space<vmem>>, vector<192x128xbf16>
    %cst = arith.constant dense<0.000000e+00> : vector<32x128xf32>
    %2 = tpu.matmul %0, %1, %cst {dimension_numbers = #tpu.dot_dimension_numbers<[1], [0], [0], [1], [0, 0, 1, 1], [], []>} : vector<32x192xbf16>, vector<192x128xbf16>, vector<32x128xf32> -> vector<32x128xf32>
    %c0_3 = arith.constant 0 : index
    %c0_4 = arith.constant 0 : index
    %3 = vector.load %arg3[%c0_3, %c0_4] : memref<32x128xf32, #tpu.memory_space<vmem>>, vector<32x128xf32>
    %4 = arith.addf %2, %3 : vector<32x128xf32>
    %5 = arith.truncf %4 : vector<32x128xf32> to vector<32x128xbf16>
    %c0_5 = arith.constant 0 : index
    %c0_6 = arith.constant 0 : index
    %6 = vector.load %arg4[%c0_5, %c0_6] : memref<32x128xbf16, #tpu.memory_space<vmem>>, vector<32x128xbf16>
    tpu.vector_store %arg4[%c0_5, %c0_6], %5 {strides = array<i32>} : memref<32x128xbf16, #tpu.memory_space<vmem>>, vector<32x128xbf16>,
    return
  }
  func.func @transform_0(%arg0: i32) -> (i32, i32) {
    %c0_i32 = arith.constant 0 : i32
    %c0_i32_0 = arith.constant 0 : i32
    return %arg0, %c0_i32 : i32, i32
  }
  func.func @transform_1(%arg0: i32) -> (i32, i32) {
    %c0_i32 = arith.constant 0 : i32
    %c0_i32_0 = arith.constant 0 : i32
    %c0_i32_1 = arith.constant 0 : i32
    return %c0_i32, %c0_i32_0 : i32, i32
  }
  func.func @transform_2(%arg0: i32) -> (i32, i32) {
    %c0_i32 = arith.constant 0 : i32
    %c0_i32_0 = arith.constant 0 : i32
    %c0_i32_1 = arith.constant 0 : i32
    return %c0_i32, %c0_i32_0 : i32, i32
  }
  func.func @transform_3(%arg0: i32) -> (i32, i32) {
    %c0_i32 = arith.constant 0 : i32
    %c0_i32_0 = arith.constant 0 : i32
    return %arg0, %c0_i32 : i32, i32
  }
}

module attributes {stable_mosaic.version = 11 : i64} {
  func.func @_head_kernel(%arg0: i32, %arg1: memref<2x128xbf16, #tpu.memory_space<vmem>>, %arg2: memref<1x128xf32, #tpu.memory_space<vmem>>, %arg3: memref<1x128xf32, #tpu.memory_space<vmem>>, %arg4: memref<128x128xbf16, #tpu.memory_space<vmem>>, %arg5: memref<1x128xf32, #tpu.memory_space<vmem>>, %arg6: memref<2x128xf32, #tpu.memory_space<vmem>>) attributes {dimension_semantics = [#tpu.dimension_semantics<arbitrary>], iteration_bounds = array<i64: 1>, scalar_prefetch = 0 : i64, scratch_operands = 0 : i64, tpu.core_type = #tpu.core_type<tc>, window_params = [{pipeline_mode = #tpu.pipeline_mode<synchronous>, transform_indices = @transform_0, window_bounds = array<i64: 2, 128>}, {pipeline_mode = #tpu.pipeline_mode<synchronous>, transform_indices = @transform_1, window_bounds = array<i64: 1, 128>}, {pipeline_mode = #tpu.pipeline_mode<synchronous>, transform_indices = @transform_2, window_bounds = array<i64: 1, 128>}, {pipeline_mode = #tpu.pipeline_mode<synchronous>, transform_indices = @transform_3, window_bounds = array<i64: 128, 128>}, {pipeline_mode = #tpu.pipeline_mode<synchronous>, transform_indices = @transform_4, window_bounds = array<i64: 1, 128>}, {pipeline_mode = #tpu.pipeline_mode<synchronous>, transform_indices = @transform_5, window_bounds = array<i64: 2, 128>}]} {
    %c0 = arith.constant 0 : index
    %c0_0 = arith.constant 0 : index
    %0 = vector.load %arg1[%c0, %c0_0] : memref<2x128xbf16, #tpu.memory_space<vmem>>, vector<2x128xbf16>
    %1 = arith.extf %0 : vector<2x128xbf16> to vector<2x128xf32>
    %c0_1 = arith.constant 0 : index
    %c0_2 = arith.constant 0 : index
    %2 = vector.load %arg2[%c0_1, %c0_2] : memref<1x128xf32, #tpu.memory_space<vmem>>, vector<1x128xf32>
    %c0_3 = arith.constant 0 : index
    %c0_4 = arith.constant 0 : index
    %3 = vector.load %arg3[%c0_3, %c0_4] : memref<1x128xf32, #tpu.memory_space<vmem>>, vector<1x128xf32>
    %cst = arith.constant dense<0.000000e+00> : vector<2xf32>
    %4 = vector.multi_reduction <add>, %1, %cst [1] : vector<2x128xf32> to vector<2xf32>
    %5 = vector.shape_cast %4 : vector<2xf32> to vector<2x1xf32>
    %cst_5 = arith.constant 1.280000e+02 : f32
    %6 = vector.broadcast %cst_5 : f32 to vector<2x1xf32>
    %7 = arith.divf %5, %6 : vector<2x1xf32>
    %8 = vector.broadcast %7 : vector<2x1xf32> to vector<2x128xf32>
    %9 = arith.subf %1, %8 : vector<2x128xf32>
    %10 = arith.mulf %9, %9 : vector<2x128xf32>
    %cst_6 = arith.constant dense<0.000000e+00> : vector<2xf32>
    %11 = vector.multi_reduction <add>, %10, %cst_6 [1] : vector<2x128xf32> to vector<2xf32>
    %12 = vector.shape_cast %11 : vector<2xf32> to vector<2x1xf32>
    %cst_7 = arith.constant 1.280000e+02 : f32
    %13 = vector.broadcast %cst_7 : f32 to vector<2x1xf32>
    %14 = arith.divf %12, %13 : vector<2x1xf32>
    %cst_8 = arith.constant 9.99999974E-6 : f32
    %15 = vector.broadcast %cst_8 : f32 to vector<2x1xf32>
    %16 = arith.addf %14, %15 : vector<2x1xf32>
    %17 = math.rsqrt %16 : vector<2x1xf32>
    %18 = vector.broadcast %17 : vector<2x1xf32> to vector<2x128xf32>
    %19 = arith.mulf %9, %18 : vector<2x128xf32>
    %20 = vector.broadcast %2 : vector<1x128xf32> to vector<2x128xf32>
    %21 = arith.mulf %19, %20 : vector<2x128xf32>
    %22 = vector.broadcast %3 : vector<1x128xf32> to vector<2x128xf32>
    %23 = arith.addf %21, %22 : vector<2x128xf32>
    %24 = arith.truncf %23 : vector<2x128xf32> to vector<2x128xbf16>
    %c0_9 = arith.constant 0 : index
    %c0_10 = arith.constant 0 : index
    %25 = vector.load %arg4[%c0_9, %c0_10] : memref<128x128xbf16, #tpu.memory_space<vmem>>, vector<128x128xbf16>
    %cst_11 = arith.constant dense<0.000000e+00> : vector<2x128xf32>
    %26 = tpu.matmul %24, %25, %cst_11 {dimension_numbers = #tpu.dot_dimension_numbers<[1], [0], [0], [1], [0, 0, 1, 1], [], []>} : vector<2x128xbf16>, vector<128x128xbf16>, vector<2x128xf32> -> vector<2x128xf32>
    %c0_12 = arith.constant 0 : index
    %c0_13 = arith.constant 0 : index
    %27 = vector.load %arg5[%c0_12, %c0_13] : memref<1x128xf32, #tpu.memory_space<vmem>>, vector<1x128xf32>
    %28 = vector.broadcast %27 : vector<1x128xf32> to vector<2x128xf32>
    %29 = arith.addf %26, %28 : vector<2x128xf32>
    %c0_14 = arith.constant 0 : index
    %c0_15 = arith.constant 0 : index
    %30 = vector.load %arg6[%c0_14, %c0_15] : memref<2x128xf32, #tpu.memory_space<vmem>>, vector<2x128xf32>
    tpu.vector_store %arg6[%c0_14, %c0_15], %29 {strides = array<i32>} : memref<2x128xf32, #tpu.memory_space<vmem>>, vector<2x128xf32>,
    return
  }
  func.func @transform_0(%arg0: i32) -> (i32, i32) {
    %c0_i32 = arith.constant 0 : i32
    %c0_i32_0 = arith.constant 0 : i32
    %c0_i32_1 = arith.constant 0 : i32
    return %c0_i32, %c0_i32_0 : i32, i32
  }
  func.func @transform_1(%arg0: i32) -> (i32, i32) {
    %c0_i32 = arith.constant 0 : i32
    %c0_i32_0 = arith.constant 0 : i32
    %c0_i32_1 = arith.constant 0 : i32
    return %c0_i32, %c0_i32_0 : i32, i32
  }
  func.func @transform_2(%arg0: i32) -> (i32, i32) {
    %c0_i32 = arith.constant 0 : i32
    %c0_i32_0 = arith.constant 0 : i32
    %c0_i32_1 = arith.constant 0 : i32
    return %c0_i32, %c0_i32_0 : i32, i32
  }
  func.func @transform_3(%arg0: i32) -> (i32, i32) {
    %c0_i32 = arith.constant 0 : i32
    %c0_i32_0 = arith.constant 0 : i32
    %c0_i32_1 = arith.constant 0 : i32
    return %c0_i32, %c0_i32_0 : i32, i32
  }
  func.func @transform_4(%arg0: i32) -> (i32, i32) {
    %c0_i32 = arith.constant 0 : i32
    %c0_i32_0 = arith.constant 0 : i32
    %c0_i32_1 = arith.constant 0 : i32
    return %c0_i32, %c0_i32_0 : i32, i32
  }
  func.func @transform_5(%arg0: i32) -> (i32, i32) {
    %c0_i32 = arith.constant 0 : i32
    %c0_i32_0 = arith.constant 0 : i32
    %c0_i32_1 = arith.constant 0 : i32
    return %c0_i32, %c0_i32_0 : i32, i32
  }
}

module attributes {stable_mosaic.version = 11 : i64} {
  func.func @_encoder_layer_kernel(%arg0: i32, %arg1: memref<2x16x128xbf16, #tpu.memory_space<vmem>>, %arg2: memref<128x384xbf16, #tpu.memory_space<vmem>>, %arg3: memref<1x384xf32, #tpu.memory_space<vmem>>, %arg4: memref<128x128xbf16, #tpu.memory_space<vmem>>, %arg5: memref<1x128xf32, #tpu.memory_space<vmem>>, %arg6: memref<128x128xbf16, #tpu.memory_space<vmem>>, %arg7: memref<1x128xf32, #tpu.memory_space<vmem>>, %arg8: memref<1x128xf32, #tpu.memory_space<vmem>>, %arg9: memref<128x128xbf16, #tpu.memory_space<vmem>>, %arg10: memref<1x128xf32, #tpu.memory_space<vmem>>, %arg11: memref<128x128xbf16, #tpu.memory_space<vmem>>, %arg12: memref<1x128xf32, #tpu.memory_space<vmem>>, %arg13: memref<1x128xf32, #tpu.memory_space<vmem>>, %arg14: memref<1x128xf32, #tpu.memory_space<vmem>>, %arg15: memref<2x16x128xbf16, #tpu.memory_space<vmem>>) attributes {dimension_semantics = [#tpu.dimension_semantics<parallel>], iteration_bounds = array<i64: 2>, scalar_prefetch = 0 : i64, scratch_operands = 0 : i64, tpu.core_type = #tpu.core_type<tc>, window_params = [{transform_indices = @transform_0, window_bounds = array<i64: 2, 16, 128>}, {pipeline_mode = #tpu.pipeline_mode<synchronous>, transform_indices = @transform_1, window_bounds = array<i64: 128, 384>}, {pipeline_mode = #tpu.pipeline_mode<synchronous>, transform_indices = @transform_2, window_bounds = array<i64: 1, 384>}, {pipeline_mode = #tpu.pipeline_mode<synchronous>, transform_indices = @transform_3, window_bounds = array<i64: 128, 128>}, {pipeline_mode = #tpu.pipeline_mode<synchronous>, transform_indices = @transform_4, window_bounds = array<i64: 1, 128>}, {pipeline_mode = #tpu.pipeline_mode<synchronous>, transform_indices = @transform_5, window_bounds = array<i64: 128, 128>}, {pipeline_mode = #tpu.pipeline_mode<synchronous>, transform_indices = @transform_6, window_bounds = array<i64: 1, 128>}, {pipeline_mode = #tpu.pipeline_mode<synchronous>, transform_indices = @transform_7, window_bounds = array<i64: 1, 128>}, {pipeline_mode = #tpu.pipeline_mode<synchronous>, transform_indices = @transform_8, window_bounds = array<i64: 128, 128>}, {pipeline_mode = #tpu.pipeline_mode<synchronous>, transform_indices = @transform_9, window_bounds = array<i64: 1, 128>}, {pipeline_mode = #tpu.pipeline_mode<synchronous>, transform_indices = @transform_10, window_bounds = array<i64: 128, 128>}, {pipeline_mode = #tpu.pipeline_mode<synchronous>, transform_indices = @transform_11, window_bounds = array<i64: 1, 128>}, {pipeline_mode = #tpu.pipeline_mode<synchronous>, transform_indices = @transform_12, window_bounds = array<i64: 1, 128>}, {pipeline_mode = #tpu.pipeline_mode<synchronous>, transform_indices = @transform_13, window_bounds = array<i64: 1, 128>}, {transform_indices = @transform_14, window_bounds = array<i64: 2, 16, 128>}]} {
    %c0 = arith.constant 0 : index
    %c0_0 = arith.constant 0 : index
    %c0_1 = arith.constant 0 : index
    %0 = vector.load %arg1[%c0, %c0_0, %c0_1] : memref<2x16x128xbf16, #tpu.memory_space<vmem>>, vector<1x16x128xbf16>
    %1 = vector.shape_cast %0 : vector<1x16x128xbf16> to vector<16x128xbf16>
    %c1 = arith.constant 1 : index
    %c0_2 = arith.constant 0 : index
    %c0_3 = arith.constant 0 : index
    %2 = vector.load %arg1[%c1, %c0_2, %c0_3] : memref<2x16x128xbf16, #tpu.memory_space<vmem>>, vector<1x16x128xbf16>
    %3 = vector.shape_cast %2 : vector<1x16x128xbf16> to vector<16x128xbf16>
    %4 = tpu.concatenate %1, %3 in 0 : vector<16x128xbf16>, vector<16x128xbf16> -> vector<32x128xbf16>
    %5 = arith.extf %4 : vector<32x128xbf16> to vector<32x128xf32>
    %c0_4 = arith.constant 0 : index
    %c0_5 = arith.constant 0 : index
    %6 = vector.load %arg2[%c0_4, %c0_5] : memref<128x384xbf16, #tpu.memory_space<vmem>>, vector<128x384xbf16>
    %cst = arith.constant dense<0.000000e+00> : vector<32x384xf32>
    %7 = tpu.matmul %4, %6, %cst {dimension_numbers = #tpu.dot_dimension_numbers<[1], [0], [0], [1], [0, 0, 1, 1], [], []>} : vector<32x128xbf16>, vector<128x384xbf16>, vector<32x384xf32> -> vector<32x384xf32>
    %c0_6 = arith.constant 0 : index
    %c0_7 = arith.constant 0 : index
    %8 = vector.load %arg3[%c0_6, %c0_7] : memref<1x384xf32, #tpu.memory_space<vmem>>, vector<1x384xf32>
    %9 = vector.broadcast %8 : vector<1x384xf32> to vector<32x384xf32>
    %10 = arith.addf %7, %9 : vector<32x384xf32>
    %11 = vector.extract_strided_slice %10 {offsets = [0, 0], sizes = [32, 128], strides = [1, 1]} : vector<32x384xf32> to vector<32x128xf32>
    %cst_8 = arith.constant 0.176776692 : f32
    %12 = vector.broadcast %cst_8 : f32 to vector<32x128xf32>
    %13 = arith.mulf %11, %12 : vector<32x128xf32>
    %14 = vector.extract_strided_slice %10 {offsets = [0, 128], sizes = [32, 128], strides = [1, 1]} : vector<32x384xf32> to vector<32x128xf32>
    %15 = vector.extract_strided_slice %10 {offsets = [0, 256], sizes = [32, 128], strides = [1, 1]} : vector<32x384xf32> to vector<32x128xf32>
    %c0_9 = arith.constant 0 : index
    %c0_10 = arith.constant 0 : index
    %16 = vector.load %arg6[%c0_9, %c0_10] : memref<128x128xbf16, #tpu.memory_space<vmem>>, vector<128x128xbf16>
    %17 = vector.extract_strided_slice %13 {offsets = [0, 0], sizes = [16, 128], strides = [1, 1]} : vector<32x128xf32> to vector<16x128xf32>
    %18 = vector.extract_strided_slice %14 {offsets = [0, 0], sizes = [16, 128], strides = [1, 1]} : vector<32x128xf32> to vector<16x128xf32>
    %19 = arith.mulf %17, %18 : vector<16x128xf32>
    %20 = arith.truncf %19 : vector<16x128xf32> to vector<16x128xbf16>
    %cst_11 = arith.constant dense<0.000000e+00> : vector<16x128xf32>
    %21 = tpu.matmul %20, %16, %cst_11 {dimension_numbers = #tpu.dot_dimension_numbers<[1], [0], [0], [1], [0, 0, 1, 1], [], []>} : vector<16x128xbf16>, vector<128x128xbf16>, vector<16x128xf32> -> vector<16x128xf32>
    %22 = vector.extract_strided_slice %14 {offsets = [16, 0], sizes = [16, 128], strides = [1, 1]} : vector<32x128xf32> to vector<16x128xf32>
    %23 = arith.mulf %17, %22 : vector<16x128xf32>
    %24 = arith.truncf %23 : vector<16x128xf32> to vector<16x128xbf16>
    %cst_12 = arith.constant dense<0.000000e+00> : vector<16x128xf32>
    %25 = tpu.matmul %24, %16, %cst_12 {dimension_numbers = #tpu.dot_dimension_numbers<[1], [0], [0], [1], [0, 0, 1, 1], [], []>} : vector<16x128xbf16>, vector<128x128xbf16>, vector<16x128xf32> -> vector<16x128xf32>
    %26 = arith.maximumf %21, %25 : vector<16x128xf32>
    %cst_13 = arith.constant 0.000000e+00 : f32
    %27 = vector.broadcast %cst_13 : f32 to vector<16x128xf32>
    %cst_14 = arith.constant 0.000000e+00 : f32
    %28 = vector.broadcast %cst_14 : f32 to vector<16x128xf32>
    %29 = arith.subf %21, %26 : vector<16x128xf32>
    %30 = math.exp %29 : vector<16x128xf32>
    %31 = arith.addf %27, %30 : vector<16x128xf32>
    %32 = vector.extract_strided_slice %15 {offsets = [0, 0], sizes = [16, 128], strides = [1, 1]} : vector<32x128xf32> to vector<16x128xf32>
    %33 = arith.mulf %30, %32 : vector<16x128xf32>
    %34 = arith.addf %28, %33 : vector<16x128xf32>
    %35 = arith.subf %25, %26 : vector<16x128xf32>
    %36 = math.exp %35 : vector<16x128xf32>
    %37 = arith.addf %31, %36 : vector<16x128xf32>
    %38 = vector.extract_strided_slice %15 {offsets = [16, 0], sizes = [16, 128], strides = [1, 1]} : vector<32x128xf32> to vector<16x128xf32>
    %39 = arith.mulf %36, %38 : vector<16x128xf32>
    %40 = arith.addf %34, %39 : vector<16x128xf32>
    %41 = tpu.reciprocal %37 : vector<16x128xf32> -> vector<16x128xf32>
    %42 = arith.mulf %40, %41 : vector<16x128xf32>
    %43 = vector.extract_strided_slice %13 {offsets = [16, 0], sizes = [16, 128], strides = [1, 1]} : vector<32x128xf32> to vector<16x128xf32>
    %44 = vector.extract_strided_slice %14 {offsets = [0, 0], sizes = [16, 128], strides = [1, 1]} : vector<32x128xf32> to vector<16x128xf32>
    %45 = arith.mulf %43, %44 : vector<16x128xf32>
    %46 = arith.truncf %45 : vector<16x128xf32> to vector<16x128xbf16>
    %cst_15 = arith.constant dense<0.000000e+00> : vector<16x128xf32>
    %47 = tpu.matmul %46, %16, %cst_15 {dimension_numbers = #tpu.dot_dimension_numbers<[1], [0], [0], [1], [0, 0, 1, 1], [], []>} : vector<16x128xbf16>, vector<128x128xbf16>, vector<16x128xf32> -> vector<16x128xf32>
    %48 = vector.extract_strided_slice %14 {offsets = [16, 0], sizes = [16, 128], strides = [1, 1]} : vector<32x128xf32> to vector<16x128xf32>
    %49 = arith.mulf %43, %48 : vector<16x128xf32>
    %50 = arith.truncf %49 : vector<16x128xf32> to vector<16x128xbf16>
    %cst_16 = arith.constant dense<0.000000e+00> : vector<16x128xf32>
    %51 = tpu.matmul %50, %16, %cst_16 {dimension_numbers = #tpu.dot_dimension_numbers<[1], [0], [0], [1], [0, 0, 1, 1], [], []>} : vector<16x128xbf16>, vector<128x128xbf16>, vector<16x128xf32> -> vector<16x128xf32>
    %52 = arith.maximumf %47, %51 : vector<16x128xf32>
    %cst_17 = arith.constant 0.000000e+00 : f32
    %53 = vector.broadcast %cst_17 : f32 to vector<16x128xf32>
    %cst_18 = arith.constant 0.000000e+00 : f32
    %54 = vector.broadcast %cst_18 : f32 to vector<16x128xf32>
    %55 = arith.subf %47, %52 : vector<16x128xf32>
    %56 = math.exp %55 : vector<16x128xf32>
    %57 = arith.addf %53, %56 : vector<16x128xf32>
    %58 = vector.extract_strided_slice %15 {offsets = [0, 0], sizes = [16, 128], strides = [1, 1]} : vector<32x128xf32> to vector<16x128xf32>
    %59 = arith.mulf %56, %58 : vector<16x128xf32>
    %60 = arith.addf %54, %59 : vector<16x128xf32>
    %61 = arith.subf %51, %52 : vector<16x128xf32>
    %62 = math.exp %61 : vector<16x128xf32>
    %63 = arith.addf %57, %62 : vector<16x128xf32>
    %64 = vector.extract_strided_slice %15 {offsets = [16, 0], sizes = [16, 128], strides = [1, 1]} : vector<32x128xf32> to vector<16x128xf32>
    %65 = arith.mulf %62, %64 : vector<16x128xf32>
    %66 = arith.addf %60, %65 : vector<16x128xf32>
    %67 = tpu.reciprocal %63 : vector<16x128xf32> -> vector<16x128xf32>
    %68 = arith.mulf %66, %67 : vector<16x128xf32>
    %69 = tpu.concatenate %42, %68 in 0 : vector<16x128xf32>, vector<16x128xf32> -> vector<32x128xf32>
    %70 = arith.truncf %69 : vector<32x128xf32> to vector<32x128xbf16>
    %c0_19 = arith.constant 0 : index
    %c0_20 = arith.constant 0 : index
    %71 = vector.load %arg4[%c0_19, %c0_20] : memref<128x128xbf16, #tpu.memory_space<vmem>>, vector<128x128xbf16>
    %cst_21 = arith.constant dense<0.000000e+00> : vector<32x128xf32>
    %72 = tpu.matmul %70, %71, %cst_21 {dimension_numbers = #tpu.dot_dimension_numbers<[1], [0], [0], [1], [0, 0, 1, 1], [], []>} : vector<32x128xbf16>, vector<128x128xbf16>, vector<32x128xf32> -> vector<32x128xf32>
    %c0_22 = arith.constant 0 : index
    %c0_23 = arith.constant 0 : index
    %73 = vector.load %arg5[%c0_22, %c0_23] : memref<1x128xf32, #tpu.memory_space<vmem>>, vector<1x128xf32>
    %74 = vector.broadcast %73 : vector<1x128xf32> to vector<32x128xf32>
    %75 = arith.addf %72, %74 : vector<32x128xf32>
    %76 = arith.addf %5, %75 : vector<32x128xf32>
    %c0_24 = arith.constant 0 : index
    %c0_25 = arith.constant 0 : index
    %77 = vector.load %arg7[%c0_24, %c0_25] : memref<1x128xf32, #tpu.memory_space<vmem>>, vector<1x128xf32>
    %c0_26 = arith.constant 0 : index
    %c0_27 = arith.constant 0 : index
    %78 = vector.load %arg8[%c0_26, %c0_27] : memref<1x128xf32, #tpu.memory_space<vmem>>, vector<1x128xf32>
    %cst_28 = arith.constant dense<0.000000e+00> : vector<32xf32>
    %79 = vector.multi_reduction <add>, %76, %cst_28 [1] : vector<32x128xf32> to vector<32xf32>
    %80 = vector.shape_cast %79 : vector<32xf32> to vector<32x1xf32>
    %cst_29 = arith.constant 1.280000e+02 : f32
    %81 = vector.broadcast %cst_29 : f32 to vector<32x1xf32>
    %82 = arith.divf %80, %81 : vector<32x1xf32>
    %83 = vector.broadcast %82 : vector<32x1xf32> to vector<32x128xf32>
    %84 = arith.subf %76, %83 : vector<32x128xf32>
    %85 = arith.mulf %84, %84 : vector<32x128xf32>
    %cst_30 = arith.constant dense<0.000000e+00> : vector<32xf32>
    %86 = vector.multi_reduction <add>, %85, %cst_30 [1] : vector<32x128xf32> to vector<32xf32>
    %87 = vector.shape_cast %86 : vector<32xf32> to vector<32x1xf32>
    %cst_31 = arith.constant 1.280000e+02 : f32
    %88 = vector.broadcast %cst_31 : f32 to vector<32x1xf32>
    %89 = arith.divf %87, %88 : vector<32x1xf32>
    %cst_32 = arith.constant 9.99999974E-6 : f32
    %90 = vector.broadcast %cst_32 : f32 to vector<32x1xf32>
    %91 = arith.addf %89, %90 : vector<32x1xf32>
    %92 = math.rsqrt %91 : vector<32x1xf32>
    %93 = vector.broadcast %92 : vector<32x1xf32> to vector<32x128xf32>
    %94 = arith.mulf %84, %93 : vector<32x128xf32>
    %95 = vector.broadcast %77 : vector<1x128xf32> to vector<32x128xf32>
    %96 = arith.mulf %94, %95 : vector<32x128xf32>
    %97 = vector.broadcast %78 : vector<1x128xf32> to vector<32x128xf32>
    %98 = arith.addf %96, %97 : vector<32x128xf32>
    %99 = arith.truncf %98 : vector<32x128xf32> to vector<32x128xbf16>
    %c0_33 = arith.constant 0 : index
    %c0_34 = arith.constant 0 : index
    %100 = vector.load %arg9[%c0_33, %c0_34] : memref<128x128xbf16, #tpu.memory_space<vmem>>, vector<128x128xbf16>
    %cst_35 = arith.constant dense<0.000000e+00> : vector<32x128xf32>
    %101 = tpu.matmul %99, %100, %cst_35 {dimension_numbers = #tpu.dot_dimension_numbers<[1], [0], [0], [1], [0, 0, 1, 1], [], []>} : vector<32x128xbf16>, vector<128x128xbf16>, vector<32x128xf32> -> vector<32x128xf32>
    %c0_36 = arith.constant 0 : index
    %c0_37 = arith.constant 0 : index
    %102 = vector.load %arg10[%c0_36, %c0_37] : memref<1x128xf32, #tpu.memory_space<vmem>>, vector<1x128xf32>
    %103 = vector.broadcast %102 : vector<1x128xf32> to vector<32x128xf32>
    %104 = arith.addf %101, %103 : vector<32x128xf32>
    %cst_38 = arith.constant 0.707106769 : f32
    %105 = vector.broadcast %cst_38 : f32 to vector<32x128xf32>
    %106 = arith.mulf %104, %105 : vector<32x128xf32>
    %107 = math.absf %106 : vector<32x128xf32>
    %cst_39 = arith.constant 0.327591091 : f32
    %108 = vector.broadcast %cst_39 : f32 to vector<32x128xf32>
    %109 = arith.mulf %108, %107 : vector<32x128xf32>
    %cst_40 = arith.constant 1.000000e+00 : f32
    %110 = vector.broadcast %cst_40 : f32 to vector<32x128xf32>
    %111 = arith.addf %110, %109 : vector<32x128xf32>
    %cst_41 = arith.constant 1.000000e+00 : f32
    %112 = vector.broadcast %cst_41 : f32 to vector<32x128xf32>
    %113 = arith.divf %112, %111 : vector<32x128xf32>
    %cst_42 = arith.constant 1.06140542 : f32
    %114 = vector.broadcast %cst_42 : f32 to vector<32x128xf32>
    %115 = arith.mulf %113, %114 : vector<32x128xf32>
    %cst_43 = arith.constant -1.45315206 : f32
    %116 = vector.broadcast %cst_43 : f32 to vector<32x128xf32>
    %117 = arith.addf %116, %115 : vector<32x128xf32>
    %118 = arith.mulf %113, %117 : vector<32x128xf32>
    %cst_44 = arith.constant 1.42141378 : f32
    %119 = vector.broadcast %cst_44 : f32 to vector<32x128xf32>
    %120 = arith.addf %119, %118 : vector<32x128xf32>
    %121 = arith.mulf %113, %120 : vector<32x128xf32>
    %cst_45 = arith.constant -0.284496725 : f32
    %122 = vector.broadcast %cst_45 : f32 to vector<32x128xf32>
    %123 = arith.addf %122, %121 : vector<32x128xf32>
    %124 = arith.mulf %113, %123 : vector<32x128xf32>
    %cst_46 = arith.constant 0.254829586 : f32
    %125 = vector.broadcast %cst_46 : f32 to vector<32x128xf32>
    %126 = arith.addf %125, %124 : vector<32x128xf32>
    %127 = arith.mulf %113, %126 : vector<32x128xf32>
    %cst_47 = arith.constant 0.000000e+00 : f32
    %128 = vector.broadcast %cst_47 : f32 to vector<32x128xf32>
    %129 = arith.subf %128, %107 : vector<32x128xf32>
    %130 = arith.mulf %129, %107 : vector<32x128xf32>
    %131 = math.exp %130 : vector<32x128xf32>
    %132 = arith.mulf %127, %131 : vector<32x128xf32>
    %cst_48 = arith.constant 1.000000e+00 : f32
    %133 = vector.broadcast %cst_48 : f32 to vector<32x128xf32>
    %134 = arith.subf %133, %132 : vector<32x128xf32>
    %cst_49 = arith.constant 0.000000e+00 : f32
    %135 = vector.broadcast %cst_49 : f32 to vector<32x128xf32>
    %136 = arith.cmpf oge, %106, %135 : vector<32x128xf32>
    %cst_50 = arith.constant 0.000000e+00 : f32
    %137 = vector.broadcast %cst_50 : f32 to vector<32x128xf32>
    %138 = arith.subf %137, %134 : vector<32x128xf32>
    %139 = arith.select %136, %134, %138 : vector<32x128xi1>, vector<32x128xf32>
    %cst_51 = arith.constant 5.000000e-01 : f32
    %140 = vector.broadcast %cst_51 : f32 to vector<32x128xf32>
    %141 = arith.mulf %140, %104 : vector<32x128xf32>
    %cst_52 = arith.constant 1.000000e+00 : f32
    %142 = vector.broadcast %cst_52 : f32 to vector<32x128xf32>
    %143 = arith.addf %142, %139 : vector<32x128xf32>
    %144 = arith.mulf %141, %143 : vector<32x128xf32>
    %145 = arith.truncf %144 : vector<32x128xf32> to vector<32x128xbf16>
    %c0_53 = arith.constant 0 : index
    %c0_54 = arith.constant 0 : index
    %146 = vector.load %arg11[%c0_53, %c0_54] : memref<128x128xbf16, #tpu.memory_space<vmem>>, vector<128x128xbf16>
    %cst_55 = arith.constant dense<0.000000e+00> : vector<32x128xf32>
    %147 = tpu.matmul %145, %146, %cst_55 {dimension_numbers = #tpu.dot_dimension_numbers<[1], [0], [0], [1], [0, 0, 1, 1], [], []>} : vector<32x128xbf16>, vector<128x128xbf16>, vector<32x128xf32> -> vector<32x128xf32>
    %c0_56 = arith.constant 0 : index
    %c0_57 = arith.constant 0 : index
    %148 = vector.load %arg12[%c0_56, %c0_57] : memref<1x128xf32, #tpu.memory_space<vmem>>, vector<1x128xf32>
    %149 = vector.broadcast %148 : vector<1x128xf32> to vector<32x128xf32>
    %150 = arith.addf %147, %149 : vector<32x128xf32>
    %151 = arith.addf %98, %150 : vector<32x128xf32>
    %c0_58 = arith.constant 0 : index
    %c0_59 = arith.constant 0 : index
    %152 = vector.load %arg13[%c0_58, %c0_59] : memref<1x128xf32, #tpu.memory_space<vmem>>, vector<1x128xf32>
    %c0_60 = arith.constant 0 : index
    %c0_61 = arith.constant 0 : index
    %153 = vector.load %arg14[%c0_60, %c0_61] : memref<1x128xf32, #tpu.memory_space<vmem>>, vector<1x128xf32>
    %cst_62 = arith.constant dense<0.000000e+00> : vector<32xf32>
    %154 = vector.multi_reduction <add>, %151, %cst_62 [1] : vector<32x128xf32> to vector<32xf32>
    %155 = vector.shape_cast %154 : vector<32xf32> to vector<32x1xf32>
    %cst_63 = arith.constant 1.280000e+02 : f32
    %156 = vector.broadcast %cst_63 : f32 to vector<32x1xf32>
    %157 = arith.divf %155, %156 : vector<32x1xf32>
    %158 = vector.broadcast %157 : vector<32x1xf32> to vector<32x128xf32>
    %159 = arith.subf %151, %158 : vector<32x128xf32>
    %160 = arith.mulf %159, %159 : vector<32x128xf32>
    %cst_64 = arith.constant dense<0.000000e+00> : vector<32xf32>
    %161 = vector.multi_reduction <add>, %160, %cst_64 [1] : vector<32x128xf32> to vector<32xf32>
    %162 = vector.shape_cast %161 : vector<32xf32> to vector<32x1xf32>
    %cst_65 = arith.constant 1.280000e+02 : f32
    %163 = vector.broadcast %cst_65 : f32 to vector<32x1xf32>
    %164 = arith.divf %162, %163 : vector<32x1xf32>
    %cst_66 = arith.constant 9.99999974E-6 : f32
    %165 = vector.broadcast %cst_66 : f32 to vector<32x1xf32>
    %166 = arith.addf %164, %165 : vector<32x1xf32>
    %167 = math.rsqrt %166 : vector<32x1xf32>
    %168 = vector.broadcast %167 : vector<32x1xf32> to vector<32x128xf32>
    %169 = arith.mulf %159, %168 : vector<32x128xf32>
    %170 = vector.broadcast %152 : vector<1x128xf32> to vector<32x128xf32>
    %171 = arith.mulf %169, %170 : vector<32x128xf32>
    %172 = vector.broadcast %153 : vector<1x128xf32> to vector<32x128xf32>
    %173 = arith.addf %171, %172 : vector<32x128xf32>
    %174 = arith.truncf %173 : vector<32x128xf32> to vector<32x128xbf16>
    %175 = vector.extract_strided_slice %174 {offsets = [0, 0], sizes = [16, 128], strides = [1, 1]} : vector<32x128xbf16> to vector<16x128xbf16>
    %c0_67 = arith.constant 0 : index
    %c0_68 = arith.constant 0 : index
    %c0_69 = arith.constant 0 : index
    %176 = vector.load %arg15[%c0_67, %c0_68, %c0_69] : memref<2x16x128xbf16, #tpu.memory_space<vmem>>, vector<1x16x128xbf16>
    %177 = vector.shape_cast %176 : vector<1x16x128xbf16> to vector<16x128xbf16>
    %178 = vector.shape_cast %175 : vector<16x128xbf16> to vector<1x16x128xbf16>
    tpu.vector_store %arg15[%c0_67, %c0_68, %c0_69], %178 {strides = array<i32>} : memref<2x16x128xbf16, #tpu.memory_space<vmem>>, vector<1x16x128xbf16>,
    %179 = vector.extract_strided_slice %174 {offsets = [16, 0], sizes = [16, 128], strides = [1, 1]} : vector<32x128xbf16> to vector<16x128xbf16>
    %c1_70 = arith.constant 1 : index
    %c0_71 = arith.constant 0 : index
    %c0_72 = arith.constant 0 : index
    %180 = vector.load %arg15[%c1_70, %c0_71, %c0_72] : memref<2x16x128xbf16, #tpu.memory_space<vmem>>, vector<1x16x128xbf16>
    %181 = vector.shape_cast %180 : vector<1x16x128xbf16> to vector<16x128xbf16>
    %182 = vector.shape_cast %179 : vector<16x128xbf16> to vector<1x16x128xbf16>
    tpu.vector_store %arg15[%c1_70, %c0_71, %c0_72], %182 {strides = array<i32>} : memref<2x16x128xbf16, #tpu.memory_space<vmem>>, vector<1x16x128xbf16>,
    return
  }
  func.func @transform_0(%arg0: i32) -> (i32, i32, i32) {
    %c0_i32 = arith.constant 0 : i32
    %c0_i32_0 = arith.constant 0 : i32
    %c0_i32_1 = arith.constant 0 : i32
    return %c0_i32, %arg0, %c0_i32_0 : i32, i32, i32
  }
  func.func @transform_1(%arg0: i32) -> (i32, i32) {
    %c0_i32 = arith.constant 0 : i32
    %c0_i32_0 = arith.constant 0 : i32
    %c0_i32_1 = arith.constant 0 : i32
    return %c0_i32, %c0_i32_0 : i32, i32
  }
  func.func @transform_2(%arg0: i32) -> (i32, i32) {
    %c0_i32 = arith.constant 0 : i32
    %c0_i32_0 = arith.constant 0 : i32
    %c0_i32_1 = arith.constant 0 : i32
    return %c0_i32, %c0_i32_0 : i32, i32
  }
  func.func @transform_3(%arg0: i32) -> (i32, i32) {
    %c0_i32 = arith.constant 0 : i32
    %c0_i32_0 = arith.constant 0 : i32
    %c0_i32_1 = arith.constant 0 : i32
    return %c0_i32, %c0_i32_0 : i32, i32
  }
  func.func @transform_4(%arg0: i32) -> (i32, i32) {
    %c0_i32 = arith.constant 0 : i32
    %c0_i32_0 = arith.constant 0 : i32
    %c0_i32_1 = arith.constant 0 : i32
    return %c0_i32, %c0_i32_0 : i32, i32
  }
  func.func @transform_5(%arg0: i32) -> (i32, i32) {
    %c0_i32 = arith.constant 0 : i32
    %c0_i32_0 = arith.constant 0 : i32
    %c0_i32_1 = arith.constant 0 : i32
    return %c0_i32, %c0_i32_0 : i32, i32
  }
  func.func @transform_6(%arg0: i32) -> (i32, i32) {
    %c0_i32 = arith.constant 0 : i32
    %c0_i32_0 = arith.constant 0 : i32
    %c0_i32_1 = arith.constant 0 : i32
    return %c0_i32, %c0_i32_0 : i32, i32
  }
  func.func @transform_7(%arg0: i32) -> (i32, i32) {
    %c0_i32 = arith.constant 0 : i32
    %c0_i32_0 = arith.constant 0 : i32
    %c0_i32_1 = arith.constant 0 : i32
    return %c0_i32, %c0_i32_0 : i32, i32
  }
  func.func @transform_8(%arg0: i32) -> (i32, i32) {
    %c0_i32 = arith.constant 0 : i32
    %c0_i32_0 = arith.constant 0 : i32
    %c0_i32_1 = arith.constant 0 : i32
    return %c0_i32, %c0_i32_0 : i32, i32
  }
  func.func @transform_9(%arg0: i32) -> (i32, i32) {
    %c0_i32 = arith.constant 0 : i32
    %c0_i32_0 = arith.constant 0 : i32
    %c0_i32_1 = arith.constant 0 : i32
    return %c0_i32, %c0_i32_0 : i32, i32
  }
  func.func @transform_10(%arg0: i32) -> (i32, i32) {
    %c0_i32 = arith.constant 0 : i32
    %c0_i32_0 = arith.constant 0 : i32
    %c0_i32_1 = arith.constant 0 : i32
    return %c0_i32, %c0_i32_0 : i32, i32
  }
  func.func @transform_11(%arg0: i32) -> (i32, i32) {
    %c0_i32 = arith.constant 0 : i32
    %c0_i32_0 = arith.constant 0 : i32
    %c0_i32_1 = arith.constant 0 : i32
    return %c0_i32, %c0_i32_0 : i32, i32
  }
  func.func @transform_12(%arg0: i32) -> (i32, i32) {
    %c0_i32 = arith.constant 0 : i32
    %c0_i32_0 = arith.constant 0 : i32
    %c0_i32_1 = arith.constant 0 : i32
    return %c0_i32, %c0_i32_0 : i32, i32
  }
  func.func @transform_13(%arg0: i32) -> (i32, i32) {
    %c0_i32 = arith.constant 0 : i32
    %c0_i32_0 = arith.constant 0 : i32
    %c0_i32_1 = arith.constant 0 : i32
    return %c0_i32, %c0_i32_0 : i32, i32
  }
  func.func @transform_14(%arg0: i32) -> (i32, i32, i32) {
    %c0_i32 = arith.constant 0 : i32
    %c0_i32_0 = arith.constant 0 : i32
    %c0_i32_1 = arith.constant 0 : i32
    return %c0_i32, %arg0, %c0_i32_0 : i32, i32, i32
  }
}

</mosaic_0001>

<bundles_post_ra>
// kernel: _lambda_.4
= control target key start
LH: loop header
LB: loop body
LE: loop exit
PB: predicated region body
PF: predicated region fallthrough
CT: control target
= control target key end

     0   :  { %s562_s12 = smov 0   ;;  %s661_s0 = inlined_call_operand.vmem [shape: bf16[64,192], index: 0, kind: input, shape index: {}]   ;;  %s662_s1 = inlined_call_operand.vmem [shape: bf16[192,128], index: 1, kind: input, shape index: {}]   ;;  %s663_s2 = inlined_call_operand.vmem [shape: f32[32,128], index: 2, kind: input, shape index: {}]   ;;  %s664_s3 = inlined_call_operand.vmem [shape: bf16[64,128], index: 3, kind: output, shape index: {}]  }
   0x1 LB: > { %s432_s13 = sadd.s32 4294967295, %s539_s12   ;;  %p436_p0 = scmp.ge.s32.totalorder %s539_s12, 1  ;;  %s539_s12 = sphi %s562_s12, %s13_s12  }
   0x2   : > { %p139_p1 = scmp.lt.s32.totalorder %s539_s12, 3 }
   0x4   : > { %p140_p2 = pnand %p436_p0, %p139_p1 }
   0x5   : > { %v515_v0 = vld [vmem:[%s662_s1] sm:$0xff] (!%p140_p2)   ;;  %v541_v1 = vmov (!%p140_p2), 0   ;;  %s437_s16 = sshll.u32 (!%p140_p2), %s432_s13, 2  ;;  %v516_v2 = vld [vmem:[%s662_s1 + $0x8] sm:$0xff] (!%p140_p2)   ;;  %v517_v3 = vld [vmem:[%s662_s1 + $0x10] sm:$0xff] (!%p140_p2)   ;;  %vm300_vm0 = vcmask (!%p140_p2), 523264  }
   0x6   : > { %143 = sbr.rel (%p140_p2) target bundleno = 273 (0x111), region = 32  ;;  %307 = vmatprep.subr.bf16.mxu0 (!%p140_p2), %v541_v1  ;;  %482 = vmatprep.subr.bf16.mxu1 (!%p140_p2), %v541_v1  ;;  %p165_p3 = scmp.lt.s32.totalorder (!%p140_p2), %s437_s16, 7  ;;  %v518_v4 = vld [vmem:[%s662_s1 + $0x18] sm:$0xff] (!%p140_p2)   ;;  %v519_v6 = vld [vmem:[%s662_s1 + $0x20] sm:$0xff] (!%p140_p2)   ;;  %v520_v8 = vld [vmem:[%s662_s1 + $0x28] sm:$0xff] (!%p140_p2)  }
   0x7   : > { %308 = vmatpush1.bf16.msra.mxu0 (!%p140_p2), %v515_v0  ;;  %494 = vmatpush1.bf16.msra.mxu1 (!%p140_p2), %v515_v0  ;;  %v521_v9 = vld [vmem:[%s662_s1 + $0x30] sm:$0xff] (!%p140_p2)   ;;  %v522_v10 = vld [vmem:[%s662_s1 + $0x38] sm:$0xff] (!%p140_p2)   ;;  %v523_v11 = vld [vmem:[%s662_s1 + $0x40] sm:$0xff] (!%p140_p2)  }
   0x8   : > { %309 = vmatprep.subr.bf16.mxu0 (!%p140_p2), %v541_v1  ;;  %483 = vmatprep.subr.bf16.mxu1 (!%p140_p2), %v541_v1  ;;  %v524_v12 = vld [vmem:[%s662_s1 + $0x48] sm:$0xff] (!%p140_p2)   ;;  %v525_v13 = vld [vmem:[%s662_s1 + $0x50] sm:$0xff] (!%p140_p2)   ;;  %v526_v14 = vld [vmem:[%s662_s1 + $0x58] sm:$0xff] (!%p140_p2)  }
   0x9   : > { %v208_v17 = vld [vmem:[%s663_s2 + $0x10] sm:$0xff] (!%p140_p2)  ;;  %v206_v18 = vld [vmem:[%s663_s2] sm:$0xff] (!%p140_p2)  ;;  %v207_v21 = vld [vmem:[%s663_s2 + $0x8] sm:$0xff] (!%p140_p2) }
   0xa   : > { %v209_v22 = vld [vmem:[%s663_s2 + $0x18] sm:$0xff] (!%p140_p2) }
   0xb   : > { %310 = vmatpush1.bf16.msra.mxu0 (!%p140_p2), %v516_v2  ;;  %495 = vmatpush1.bf16.msra.mxu1 (!%p140_p2), %v516_v2 }
   0xc   : > { %311 = vmatprep.subr.bf16.mxu0 (!%p140_p2), %v541_v1  ;;  %484 = vmatprep.subr.bf16.mxu1 (!%p140_p2), %v541_v1 }
   0xd   : > { %s666_s16 = smov (!%p165_p3, %s437_s16), 7 }
   0xe   : > { %s466_s21 = sshll.u32 %s666_s16, 3 }
   0xf   : > { %312 = vmatpush1.bf16.msra.mxu0 %v517_v3  ;;  %496 = vmatpush1.bf16.msra.mxu1 %v517_v3  ;;  %s594_s26 = scalar_lea.vmem %s661_s0, %s466_s21 }
  0x10   : > { %313 = vmatprep.subr.bf16.mxu0 %v541_v1  ;;  %485 = vmatprep.subr.bf16.mxu1 %v541_v1  ;;  %v529_v5 = vld [vmem:[%s594_s26 + $0x4] ss:$8 sps:$4 sm:$0xff]   ;;  %v532_v7 = vld [vmem:[%s594_s26 + $0x14] ss:$8 sps:$4 sm:$0xff]   ;;  %v527_v15 = vld [vmem:[%s594_s26] ss:$8 sps:$4 sm:$0xff]  }
  0x11   : > { %458 = vmatprep.mubr.msk.bf16.mxu0 %vm300_vm0, %v529_v5  ;;  %459 = vmatprep.mubr.msk.bf16.mxu1 %vm300_vm0, %v532_v7  ;;  %v530_v16 = vld [vmem:[%s594_s26 + $0x10] ss:$8 sps:$4 sm:$0xff]   ;;  %s441_s26 = sshll.u32 %s666_s16, 2 }
  0x12   : > { %s175_s29 = scalar_lea.vmem %s664_s3, %s441_s26 }
  0x13   : > { %314 = vmatpush1.bf16.msra.mxu0 %v518_v4  ;;  %497 = vmatpush1.bf16.msra.mxu1 %v518_v4 }
  0x14   : > { %315 = vmatprep.subr.bf16.mxu0 %v541_v1  ;;  %486 = vmatprep.subr.bf16.mxu1 %v541_v1 }
  0x17   : > { %316 = vmatpush1.bf16.msra.mxu0 %v519_v6  ;;  %498 = vmatpush1.bf16.msra.mxu1 %v519_v6 }
  0x18   : > { %317 = vmatprep.subr.bf16.mxu0 %v541_v1  ;;  %487 = vmatprep.subr.bf16.mxu1 %v541_v1 }
  0x1b   : > { %318 = vmatpush1.bf16.msra.mxu0 %v520_v8  ;;  %499 = vmatpush1.bf16.msra.mxu1 %v520_v8 }
  0x1c   : > { %319 = vmatprep.subr.bf16.mxu0 %v541_v1  ;;  %488 = vmatprep.subr.bf16.mxu1 %v541_v1 }
  0x1f   : > { %320 = vmatpush1.bf16.msra.mxu0 %v521_v9  ;;  %500 = vmatpush1.bf16.msra.mxu1 %v521_v9 }
  0x20   : > { %321 = vmatprep.subr.bf16.mxu0 %v541_v1  ;;  %489 = vmatprep.subr.bf16.mxu1 %v541_v1 }
  0x23   : > { %322 = vmatpush1.bf16.msra.mxu0 %v522_v10  ;;  %501 = vmatpush1.bf16.msra.mxu1 %v522_v10 }
  0x24   : > { %323 = vmatprep.subr.bf16.mxu0 %v541_v1  ;;  %490 = vmatprep.subr.bf16.mxu1 %v541_v1 }
  0x27   : > { %324 = vmatpush1.bf16.msra.mxu0 %v523_v11  ;;  %502 = vmatpush1.bf16.msra.mxu1 %v523_v11 }
  0x28   : > { %325 = vmatprep.subr.bf16.mxu0 %v541_v1  ;;  %491 = vmatprep.subr.bf16.mxu1 %v541_v1 }
  0x2b   : > { %326 = vmatpush1.bf16.msra.mxu0 %v524_v12  ;;  %503 = vmatpush1.bf16.msra.mxu1 %v524_v12 }
  0x2c   : > { %327 = vmatprep.subr.bf16.mxu0 %v541_v1  ;;  %492 = vmatprep.subr.bf16.mxu1 %v541_v1 }
  0x2f   : > { %328 = vmatpush1.bf16.msra.mxu0 %v525_v13  ;;  %504 = vmatpush1.bf16.msra.mxu1 %v525_v13 }
  0x30   : > { %329 = vmatprep.subr.bf16.mxu0 %v541_v1  ;;  %493 = vmatprep.subr.bf16.mxu1 %v541_v1 }
  0x33   : > { %330 = vmatpush1.bf16.msra.mxu0 %v526_v14  ;;  %505 = vmatpush1.bf16.msra.mxu1 %v526_v14 }
  0x36   : > { %340 = vmatmul.mubr.bf16.vlgmr.msra.gmra.mrb[0].mxu0 %v527_v15  ;;  %348 = vmatmul.mubr.bf16.vlgmr.msra.gmra.mrb[0].mxu1 %v530_v16 }
 0x109   : > { %v341_v19 = vpop.f32.mrb[0].mxu0  ;;  %v349_v20 = vpop.f32.mrb[0].mxu1 }
 0x10a   : > { %v350_v23 = vadd.f32 %v349_v20, %v208_v17  ;;  %v343_v24 = vpop.f32.mrb[1].mxu0  ;;  %v351_v25 = vpop.f32.mrb[1].mxu1  ;;  %v342_v28 = vadd.f32 %v341_v19, %v206_v18 }
 0x10b   : > { %v344_v26 = vpop.f32.mrb[2].mxu0  ;;  %v352_v27 = vpop.f32.mrb[2].mxu1 }
 0x10c   : > { %v345_v29 = vadd.f32 %v344_v26, %v207_v21  ;;  %v353_v30 = vadd.f32 %v352_v27, %v209_v22  ;;  %v346_v31 = vpop.f32.mrb[3].mxu0  ;;  %v354_v32 = vpop.f32.mrb[3].mxu1 }
 0x10e   : > { %v474_v33 = vpack.c.bf16 %v345_v29, %v342_v28  ;;  %v479_v34 = vpack.c.bf16 %v353_v30, %v350_v23 }
 0x110   : > { %475 = vst [vmem:[%s175_s29] sm:$0xff] %v474_v33   ;;  %481 = vst [vmem:[%s175_s29 + $0x8] sm:$0xff] %v479_v34  }
 0x111 PF: > { %s13_s12 = sadd.s32 1, %s539_s12  }
 0x112   : > { %p10_p4 = scmp.ge.s32.totalorder %s13_s12, 4  }
 0x114   :  { %12 = sbr.rel (!%p10_p4) target bundleno = 1 (0x1), region = 62 }

// kernel: _lambda_.7
= control target key start
LH: loop header
LB: loop body
LE: loop exit
PB: predicated region body
PF: predicated region fallthrough
CT: control target
= control target key end

     0   :  { %vm26_vm0 = vcmask 1041408   ;;  %s342_s0 = inlined_call_operand.vmem [shape: bf16[2,128], index: 0, kind: input, shape index: {}]   ;;  %s343_s1 = inlined_call_operand.vmem [shape: f32[1,128], index: 1, kind: input, shape index: {}]   ;;  %s344_s2 = inlined_call_operand.vmem [shape: f32[1,128], index: 2, kind: input, shape index: {}, may-alias: {2,4}]   ;;  %s345_s3 = inlined_call_operand.vmem [shape: bf16[128,128], index: 3, kind: input, shape index: {}]   ;;  %s346_s4 = inlined_call_operand.vmem [shape: f32[1,128], index: 4, kind: input, shape index: {}, may-alias: {2,4}]   ;;  %s347_s5 = inlined_call_operand.hbm [shape: f32[2,128], index: 5, kind: output, shape index: {}]  }
   0x1   :  { %v22_v0 = vld [vmem:[%s342_s0] sm:$0x1] }
   0x2   :  { %v23_v1 = vunpack.c.l.bf16 %v22_v0 }
   0x4   :  { %v27_v2 = vsel %vm26_vm0, %v23_v1, 0.0 }
   0x5   :  { %28 = vadd.xlane.f32.xlu0 %v27_v2 }
   0x6   :  { %10 = vsyncpa [#allocation3], 0  ;;  %v225_v3 = vld [vmem:[%s345_s3] sm:$0xff]   ;;  %v259_v4 = vmov 0.0   ;;  %v226_v5 = vld [vmem:[%s345_s3 + $0x8] sm:$0xff]   ;;  %vm260_vm1 = vmmov 0  }
   0x7   :  { %202 = vmatprep.subr.bf16.mxu0 %v259_v4  ;;  %v227_v11 = vld [vmem:[%s345_s3 + $0x10] sm:$0xff]   ;;  %v228_v12 = vld [vmem:[%s345_s3 + $0x18] sm:$0xff]   ;;  %v229_v13 = vld [vmem:[%s345_s3 + $0x20] sm:$0xff]   ;;  %218 = vmatprep.mubr.msk.bf16.mxu0 %vm260_vm1, %v259_v4  ;;  %s261_s15 = smov [#allocation2]  }
   0x8   :  { %203 = vmatpush3.bf16.msra.mxu0 %v225_v3  ;;  %v230_v14 = vld [vmem:[%s345_s3 + $0x28] sm:$0xff]   ;;  %v231_v15 = vld [vmem:[%s345_s3 + $0x30] sm:$0xff]   ;;  %v232_v16 = vld [vmem:[%s345_s3 + $0x38] sm:$0xff]   ;;  %s174_s16 = sshll.u32 %s261_s15, 4  ;;  %s175_s16 = int_to_ptr.vmem [resolvable:$true] %s174_s16 }
   0x9   :  { %204 = vmatprep.subr.bf16.mxu0 %v259_v4  ;;  %v182_v21 = vld [vmem:[%s343_s1] ss:$0 sm:$0xff]  ;;  %s235_s1 = scalar_lea.vmem %s175_s16, 32  ;;  %p240_p1 = scmp.lt.s32.totalorder %s175_s16, %s175_s16 }
   0xa   :  { %v183_v23 = vld [vmem:[%s344_s2] ss:$0 sm:$0xff]  ;;  %p236_p0 = scmp.ne.s32.totalorder %s175_s16, %s235_s1  ;;  %p241_p2 = scmp.lt.s32.totalorder %s235_s1, %s235_s1 }
   0xb   :  { %v184_v27 = vld [vmem:[%s346_s4] ss:$0 sm:$0xff] }
   0xc   :  { %205 = vmatpush3.bf16.msra.mxu0 %v226_v5  ;;  %p242_p3 = por %p241_p2, %p240_p1 }
   0xd   :  { %206 = vmatprep.subr.bf16.mxu0 %v259_v4 }
   0xe   :  { %p243_p4 = pnand %p242_p3, %p236_p0 }
  0x10   :  { %207 = vmatpush3.bf16.msra.mxu0 %v227_v11 }
  0x11   :  { %208 = vmatprep.subr.bf16.mxu0 %v259_v4 }
  0x14   :  { %209 = vmatpush3.bf16.msra.mxu0 %v228_v12 }
  0x15   :  { %210 = vmatprep.subr.bf16.mxu0 %v259_v4 }
  0x18   :  { %211 = vmatpush3.bf16.msra.mxu0 %v229_v13 }
  0x19   :  { %212 = vmatprep.subr.bf16.mxu0 %v259_v4 }
  0x1c   :  { %213 = vmatpush3.bf16.msra.mxu0 %v230_v14 }
  0x1d   :  { %214 = vmatprep.subr.bf16.mxu0 %v259_v4 }
  0x20   :  { %215 = vmatpush3.bf16.msra.mxu0 %v231_v15 }
  0x21   :  { %216 = vmatprep.subr.bf16.mxu0 %v259_v4 }
  0x24   :  { %217 = vmatpush3.bf16.msra.mxu0 %v232_v16 }
  0x92   :  { %v29_v6 = vpop.xlane.xlu0 %28 }
  0x93   :  { %v31_v7 = vmul.f32 0.0078125, %v29_v6 }
  0x95   :  { %v32_v8 = vsub.f32 %v23_v1, %v31_v7 }
  0x97   :  { %v33_v9 = vmul.f32 %v32_v8, %v32_v8 }
  0x99   :  { %v34_v10 = vsel %vm26_vm0, %v33_v9, 0.0 }
  0x9a   :  { %35 = vadd.xlane.f32.xlu0 %v34_v10 }
 0x127   :  { %v36_v17 = vpop.xlane.xlu0 %35 }
 0x128   :  { %v37_v18 = vmul.f32 0.0078125, %v36_v17 }
 0x12a   :  { %v38_v19 = vadd.f32 1e-05, %v37_v18 }
 0x12c   :  { %233 = vrsqrt.f32 %v38_v19 }
 0x136   :  { %v234_v20 = vpop.eup %233 }
 0x137   :  { %v40_v22 = vmul.f32 %v234_v20, %v32_v8 }
 0x139   :  { %v47_v24 = vmul.f32 %v182_v21, %v40_v22 }
 0x13b   :  { %v54_v25 = vadd.f32 %v183_v23, %v47_v24 }
 0x13d   :  { %v55_v26 = vpack.c.bf16 %v54_v25, %v54_v25 }
 0x13f   :  { %219 = vmatmul.mubr.bf16.vlgmr.msra.gmra.mrb[0].mxu0 %v55_v26 }
 0x212   :  { %v161_v28 = vpop.f32.mrb[0].mxu0 }
 0x213   :  { %v162_v29 = vadd.f32 %v184_v27, %v161_v28  ;;  %v220_v30 = vpop.f32.mrb[1].mxu0 }
 0x214   :  { %v164_v31 = vpop.f32.mrb[2].mxu0 }
 0x215   :  { %167 = vst [vmem:[#allocation2] sm:$0x3] %v162_v29  ;;  %v221_v32 = vpop.f32.mrb[3].mxu0 }
 0x216   :  { %246 = shalt.err (!%p243_p4)
}
 0x217   :  { %s247_s4 = scalar_lea.hbm %s347_s5, 32 }
 0x218   :  { %p248_p5 = scmp.ne.s32.totalorder %s347_s5, %s247_s4  ;;  %p251_p6 = scmp.lt.u32.totalorder %s247_s4, %s347_s5 }
 0x21a   :  { %p253_p7 = pnand %p251_p6, %p248_p5 }
 0x21c   :  { %256 = shalt.err (!%p253_p7)
}
 0x21d   :  { %177 = dma.vmem_to_hbm [thread:$0]  %s175_s16, 32, %s347_s5, [#allocation3]  }
 0x21e   :  { %257 = dma.done.wait [#allocation3], 32  }
 0x21f   :  { %258 = vsyncadd [#allocation3], 4294967264 }
 0x220   :  { %181 = vsyncpa [#allocation3], 1 }

// kernel: _lambda_.5
= control target key start
LH: loop header
LB: loop body
LE: loop exit
PB: predicated region body
PF: predicated region fallthrough
CT: control target
= control target key end

     0   :  { %s2468_s29 = smov 0   ;;  %s2470_s30 = smov 0   ;;  %s2898_s0 = inlined_call_operand.vmem [shape: bf16[2,32,128], index: 0, kind: input, shape index: {}]   ;;  %s2899_s1 = inlined_call_operand.vmem [shape: bf16[128,384], index: 1, kind: input, shape index: {}]   ;;  %s2900_s2 = inlined_call_operand.vmem [shape: f32[1,384], index: 2, kind: input, shape index: {}]   ;;  %s2901_s3 = inlined_call_operand.vmem [shape: bf16[128,128], index: 3, kind: input, shape index: {}]   ;;  %s2902_s4 = inlined_call_operand.vmem [shape: f32[1,128], index: 4, kind: input, shape index: {}, may-alias: {4,7,9,11,13}]   ;;  %s2903_s5 = inlined_call_operand.vmem [shape: bf16[128,128], index: 5, kind: input, shape index: {}]   ;;  %s2904_s6 = inlined_call_operand.vmem [shape: f32[1,128], index: 6, kind: input, shape index: {}, may-alias: {6,12}]   ;;  %s2905_s7 = inlined_call_operand.vmem [shape: f32[1,128], index: 7, kind: input, shape index: {}, may-alias: {4,7,9,11,13}]   ;;  %s2906_s8 = inlined_call_operand.vmem [shape: bf16[128,128], index: 8, kind: input, shape index: {}]   ;;  %s2907_s9 = inlined_call_operand.vmem [shape: f32[1,128], index: 9, kind: input, shape index: {}, may-alias: {4,7,9,11,13}]   ;;  %s2908_s10 = inlined_call_operand.vmem [shape: bf16[128,128], index: 10, kind: input, shape index: {}]   ;;  %s2909_s11 = inlined_call_operand.vmem [shape: f32[1,128], index: 11, kind: input, shape index: {}, may-alias: {4,7,9,11,13}]   ;;  %s2910_s12 = inlined_call_operand.vmem [shape: f32[1,128], index: 12, kind: input, shape index: {}, may-alias: {6,12}]   ;;  %s2911_s13 = inlined_call_operand.vmem [shape: f32[1,128], index: 13, kind: input, shape index: {}, may-alias: {4,7,9,11,13}]   ;;  %s2912_s14 = inlined_call_operand.vmem [shape: bf16[2,32,128], index: 14, kind: output, shape index: {}]  }
   0x1   :  { %s2472_s15 = smov 0  }
   0x2 LB: > { %s2913_s16 = sadd.s32 4294967295, %s2388_s15   ;;  %s2485_s17 = sadd.s32 1, %s2388_s15   ;;  %s2388_s15 = sphi %s2472_s15, %s2920_s15   ;;  %s2384_s30 = sphi %s2470_s30, %s2919_s30   ;;  %s2380_s29 = sphi %s2468_s29, %s2918_s29  }
   0x3   : > { %s28_s18 = ssub.s32 %s2388_s15, %s2485_s17  ;;  %s31_s19 = sadd.s32 1, %s2384_s30 }
   0x4   : > { %p29_p0 = scmp.eq.s32.totalorder %s28_s18, 0  ;;  %p38_p1 = scmp.ne.s32.totalorder %s2384_s30, %s2380_s29 }
   0x5   : > { %p39_p2 = scmp.eq.s32.totalorder %s2388_s15, 0  ;;  %p341_p3 = scmp.eq.s32.totalorder %s2913_s16, 1 }
   0x6   : > { %s2496_s20 = scalar_select %p29_p0, %s2384_s30, %s31_s19  }
   0x7   : > { %p40_p4 = por %p39_p2, %p38_p1  ;;  %p2498_p5 = por %p341_p3, %p38_p1 }
   0x8   : > { %p1879_p6 = scmp.ge.s32.totalorder %s2388_s15, 2 }
   0xa   : > { %402 = sbr.rel (%p1879_p6) target bundleno = 24 (0x18), region = 68 }
  0x11   : > { %405 = sbr.rel (!%p40_p4) target bundleno = 24 (0x18), region = 72  ;;  %s407_s22 = sand.u32 (%p40_p4), 1, %s2384_s30  }
  0x12   : > { %s1964_s23 = sshll.u32 (%p40_p4), %s2388_s15, 3  ;;  %s1880_s24 = sshll.u32 (%p40_p4), %s407_s22, 4 }
  0x13   : > { %s412_s27 = scalar_lea.vmem (%p40_p4), %s2898_s0, %s1964_s23  ;;  %s409_s28 = scalar_lea.vmem (%p40_p4), [#allocation2], %s1880_s24 }
  0x14   : > { %v428_v0 = vld [vmem:[%s412_s27] sm:$0xff] (%p40_p4)   ;;  %v432_v1 = vld [vmem:[%s412_s27 + $0x10] sm:$0xff] (%p40_p4)  }
  0x15   : > { %429 = vst [vmem:[%s409_s28] sm:$0xff] (%p40_p4), %v428_v0   ;;  %433 = vst [vmem:[%s409_s28 + $0x8] sm:$0xff] (%p40_p4), %v432_v1  }
  0x18 PF: > { %p1883_p7 = scmp.ge.s32.totalorder %s2388_s15, 1  ;;  %p465_p8 = scmp.lt.s32.totalorder %s2388_s15, 3 }
  0x1a   : > { %p466_p9 = pnand %p1883_p7, %p465_p8 }
  0x1b   : > { %v2244_v2 = vld [vmem:[%s2899_s1 + $0x4] ss:$12 sps:$4 sm:$0xff] (!%p466_p9)   ;;  %v2246_v3 = vld [vmem:[%s2899_s1] ss:$12 sps:$4 sm:$0xff] (!%p466_p9)   ;;  %v2390_v4 = vmov (!%p466_p9), 0   ;;  %s472_s26 = sand.u32 (!%p466_p9), 1, %s2380_s29   ;;  %v574_v38 = vlaneseq (!%p466_p9) }
  0x1c   : > { %469 = sbr.rel (%p466_p9) target bundleno = 1921 (0x781), region = 113  ;;  %749 = vmatprep.mubr.bf16.mxu0 (!%p466_p9), %v2390_v4  ;;  %717 = vmatprep.subr.bf16.mxu0 (!%p466_p9), %v2244_v2  ;;  %v2247_v5 = vld [vmem:[%s2899_s1 + $0x1c] ss:$12 sps:$4 sm:$0xff] (!%p466_p9)   ;;  %v2249_v6 = vld [vmem:[%s2899_s1 + $0x18] ss:$12 sps:$4 sm:$0xff] (!%p466_p9)   ;;  %s2526_s22 = sshll.u32 (!%p466_p9), %s472_s26, 4 }
  0x1d   : > { %718 = vmatpush1.bf16.msra.mxu0 (!%p466_p9), %v2246_v3  ;;  %v2250_v7 = vld [vmem:[%s2899_s1 + $0x34] ss:$12 sps:$4 sm:$0xff] (!%p466_p9)   ;;  %v2252_v8 = vld [vmem:[%s2899_s1 + $0x30] ss:$12 sps:$4 sm:$0xff] (!%p466_p9)   ;;  %v2253_v9 = vld [vmem:[%s2899_s1 + $0x4c] ss:$12 sps:$4 sm:$0xff] (!%p466_p9)  }
  0x1e   : > { %719 = vmatprep.subr.bf16.mxu0 (!%p466_p9), %v2247_v5  ;;  %v2255_v10 = vld [vmem:[%s2899_s1 + $0x48] ss:$12 sps:$4 sm:$0xff] (!%p466_p9)   ;;  %s2914_s28 = scalar_lea.vmem (!%p466_p9), [#allocation2], %s2526_s22  ;;  %v2256_v12 = vld [vmem:[%s2899_s1 + $0x64] ss:$12 sps:$4 sm:$0xff] (!%p466_p9)   ;;  %v2391_v28 = vmov (!%p466_p9), 0.0  }
  0x1f   : > { %v2540_v11 = vld [vmem:[%s2914_s28] sm:$0xff] (!%p466_p9)   ;;  %v2259_v16 = vld [vmem:[%s2899_s1 + $0x7c] ss:$12 sps:$4 sm:$0xff] (!%p466_p9)   ;;  %v2265_v22 = vld [vmem:[%s2899_s1 + $0xac] ss:$12 sps:$4 sm:$0xff] (!%p466_p9)   ;;  %s2916_s25 = scalar_lea.vmem (!%p466_p9), [#allocation2], %s2526_s22 }
  0x20   : > { %v2270_v13 = vld [vmem:[%s2899_s1 + $0x8] ss:$12 sps:$4 sm:$0xff] (!%p466_p9)   ;;  %2073 = vmatprep.mubr.bf16.mxu1 (!%p466_p9), %v2540_v11  ;;  %v2271_v14 = vld [vmem:[%s2899_s1 + $0x20] ss:$12 sps:$4 sm:$0xff] (!%p466_p9)   ;;  %v2272_v17 = vld [vmem:[%s2899_s1 + $0x38] ss:$12 sps:$4 sm:$0xff] (!%p466_p9)  }
  0x21   : > { %720 = vmatpush1.bf16.msra.mxu0 (!%p466_p9), %v2249_v6  ;;  %v2258_v15 = vld [vmem:[%s2899_s1 + $0x60] ss:$12 sps:$4 sm:$0xff] (!%p466_p9)   ;;  %2057 = vmatprep.subr.bf16.mxu1 (!%p466_p9), %v2270_v13  ;;  %v2261_v18 = vld [vmem:[%s2899_s1 + $0x78] ss:$12 sps:$4 sm:$0xff] (!%p466_p9)   ;;  %v2273_v20 = vld [vmem:[%s2899_s1 + $0x50] ss:$12 sps:$4 sm:$0xff] (!%p466_p9)  }
  0x22   : > { %721 = vmatprep.subr.bf16.mxu0 (!%p466_p9), %v2250_v7  ;;  %2058 = vmatpush3.bf16.msra.mxu1 (!%p466_p9), %v2270_v13  ;;  %v2262_v19 = vld [vmem:[%s2899_s1 + $0x94] ss:$12 sps:$4 sm:$0xff] (!%p466_p9)   ;;  %v2264_v21 = vld [vmem:[%s2899_s1 + $0x90] ss:$12 sps:$4 sm:$0xff] (!%p466_p9)   ;;  %v2276_v27 = vld [vmem:[%s2899_s1 + $0x98] ss:$12 sps:$4 sm:$0xff] (!%p466_p9)  }
  0x23   : > { %2059 = vmatprep.subr.bf16.mxu1 %v2271_v14  ;;  %v2274_v23 = vld [vmem:[%s2899_s1 + $0x68] ss:$12 sps:$4 sm:$0xff]   ;;  %v2275_v25 = vld [vmem:[%s2899_s1 + $0x80] ss:$12 sps:$4 sm:$0xff]   ;;  %v2277_v30 = vld [vmem:[%s2899_s1 + $0xb0] ss:$12 sps:$4 sm:$0xff]  }
  0x24   : > { %v2267_v24 = vld [vmem:[%s2899_s1 + $0xa8] ss:$12 sps:$4 sm:$0xff]   ;;  %v2588_v26 = vld [vmem:[%s2903_s5] sm:$0xff]   ;;  %v2619_v33 = vld [vmem:[%s2903_s5 + $0x18] sm:$0xff]   ;;  %vm2392_vm0 = vmmov 0   ;;  %v2676_v39 = vshrl.u32 %v574_v38, 7 }
  0x25   : > { %722 = vmatpush1.bf16.msra.mxu0 %v2252_v8  ;;  %v2597_v29 = vld [vmem:[%s2903_s5 + $0x8] sm:$0xff]   ;;  %v2612_v32 = vld [vmem:[%s2903_s5 + $0x10] sm:$0xff]   ;;  %v2630_v34 = vld [vmem:[%s2903_s5 + $0x20] sm:$0xff]   ;;  %s515_s23 = scalar_lea.vmem [#allocation3], %s2526_s22  ;;  %s2917_s29 = sadd.s32 (%p2498_p5), 4294967295, %s2388_s15  }
  0x26   : > { %723 = vmatprep.subr.bf16.mxu0 %v2253_v9  ;;  %2060 = vmatpush3.bf16.msra.mxu1 %v2271_v14  ;;  %v2606_v31 = vld [vmem:[%s2916_s25 + $0x8] sm:$0xff]   ;;  %v2657_v36 = vld [vmem:[%s2903_s5 + $0x30] sm:$0xff]   ;;  %v576_v40 = vsub.s32 0, %v2676_v39  ;;  %v2682_v41 = vld [vmem:[%s2900_s2] sm:$0x7]  ;;  %v580_v42 = vsub.s32 1, %v2676_v39 }
  0x27   : > { %2061 = vmatprep.subr.bf16.mxu1 %v2272_v17  ;;  %v2639_v35 = vld [vmem:[%s2903_s5 + $0x28] sm:$0xff]   ;;  %v2666_v37 = vld [vmem:[%s2903_s5 + $0x38] sm:$0xff]   ;;  %s1969_s24 = sshll.u32 (%p2498_p5), %s2917_s29, 3 }
  0x28   : > { %v577_v43 = vrot.slane %v2682_v41, %v576_v40  ;;  %v581_v44 = vrot.slane %v2682_v41, %v580_v42  ;;  %s1768_s26 = scalar_lea.vmem (%p2498_p5), %s2912_s14, %s1969_s24 }
  0x29   : > { %724 = vmatpush1.bf16.msra.mxu0 %v2255_v10 }
  0x2a   : > { %725 = vmatprep.subr.bf16.mxu0 %v2256_v12  ;;  %2062 = vmatpush3.bf16.msra.mxu1 %v2272_v17 }
  0x2b   : > { %2063 = vmatprep.subr.bf16.mxu1 %v2273_v20 }
  0x2d   : > { %726 = vmatpush1.bf16.msra.mxu0 %v2258_v15 }
  0x2e   : > { %727 = vmatprep.subr.bf16.mxu0 %v2259_v16  ;;  %2064 = vmatpush3.bf16.msra.mxu1 %v2273_v20  ;;  %v2288_v20 = vld [vmem:[%s2901_s3 + $0x10] sm:$0xff]  }
  0x2f   : > { %2065 = vmatprep.subr.bf16.mxu1 %v2274_v23 }
  0x31   : > { %728 = vmatpush1.bf16.msra.mxu0 %v2261_v18  ;;  %v2286_v18 = vld [vmem:[%s2901_s3] sm:$0xff]  }
  0x32   : > { %729 = vmatprep.subr.bf16.mxu0 %v2262_v19  ;;  %2066 = vmatpush3.bf16.msra.mxu1 %v2274_v23  ;;  %v2287_v19 = vld [vmem:[%s2901_s3 + $0x8] sm:$0xff]  }
  0x33   : > { %2067 = vmatprep.subr.bf16.mxu1 %v2275_v25  ;;  %v2291_v23 = vld [vmem:[%s2901_s3 + $0x28] sm:$0xff]  }
  0x35   : > { %730 = vmatpush1.bf16.msra.mxu0 %v2264_v21  ;;  %v2289_v21 = vld [vmem:[%s2901_s3 + $0x18] sm:$0xff]  }
  0x36   : > { %731 = vmatprep.subr.bf16.mxu0 %v2265_v22  ;;  %2068 = vmatpush3.bf16.msra.mxu1 %v2275_v25  ;;  %v2290_v22 = vld [vmem:[%s2901_s3 + $0x20] sm:$0xff]   ;;  %v2293_v25 = vld [vmem:[%s2901_s3 + $0x38] sm:$0xff]  }
  0x37   : > { %2069 = vmatprep.subr.bf16.mxu1 %v2276_v27 }
  0x39   : > { %732 = vmatpush1.bf16.msra.mxu0 %v2267_v24  ;;  %v2292_v24 = vld [vmem:[%s2901_s3 + $0x30] sm:$0xff]  }
  0x3a   : > { %2077 = vmatprep.subr.bf16.mxu0 %v2391_v28  ;;  %2070 = vmatpush3.bf16.msra.mxu1 %v2276_v27 }
  0x3b   : > { %2071 = vmatprep.subr.bf16.mxu1 %v2277_v30 }
  0x3c   : > { %750 = vmatmul.mubr.bf16.vlgmr.msra.gmra.mrb[0].mxu0 %v2540_v11 }
  0x3d   : > { %759 = vmatprep.mubr.bf16.mxu0 %v2390_v4  ;;  %2078 = vmatpush3.bf16.msra.mxu0 %v2588_v26 }
  0x3e   : > { %2079 = vmatprep.subr.bf16.mxu0 %v2391_v28  ;;  %2072 = vmatpush3.bf16.msra.mxu1 %v2277_v30 }
  0x3f   : > { %2097 = vmatprep.subr.bf16.mxu1 %v2391_v28 }
  0x41   : > { %2080 = vmatpush3.bf16.msra.mxu0 %v2597_v29  ;;  %2074 = vmatmul.mubr.bf16.vlgmr.msra.gmra.mrb[0].mxu1 %v2606_v31 }
  0x42   : > { %2081 = vmatprep.subr.bf16.mxu0 %v2391_v28  ;;  %2098 = vmatpush3.bf16.msra.mxu1 %v2588_v26 }
  0x43   : > { %2099 = vmatprep.subr.bf16.mxu1 %v2391_v28  ;;  %2113 = vmatprep.mubr.msk.bf16.mxu1 %vm2392_vm0, %v2391_v28 }
  0x44   : > { %760 = vmatmul.mubr.bf16.gmra.mrb[4].mxu0 %v2606_v31 }
  0x45   : > { %2082 = vmatpush3.bf16.msra.mxu0 %v2612_v32  ;;  %2093 = vmatprep.mubr.msk.bf16.mxu0 %vm2392_vm0, %v2391_v28 }
  0x46   : > { %2083 = vmatprep.subr.bf16.mxu0 %v2391_v28  ;;  %2100 = vmatpush3.bf16.msra.mxu1 %v2597_v29 }
  0x47   : > { %2101 = vmatprep.subr.bf16.mxu1 %v2391_v28 }
  0x49   : > { %2084 = vmatpush3.bf16.msra.mxu0 %v2619_v33 }
  0x4a   : > { %2085 = vmatprep.subr.bf16.mxu0 %v2391_v28  ;;  %2102 = vmatpush3.bf16.msra.mxu1 %v2612_v32 }
  0x4b   : > { %2103 = vmatprep.subr.bf16.mxu1 %v2391_v28 }
  0x4d   : > { %2086 = vmatpush3.bf16.msra.mxu0 %v2630_v34 }
  0x4e   : > { %2087 = vmatprep.subr.bf16.mxu0 %v2391_v28  ;;  %2104 = vmatpush3.bf16.msra.mxu1 %v2619_v33 }
  0x4f   : > { %2105 = vmatprep.subr.bf16.mxu1 %v2391_v28 }
  0x51   : > { %2088 = vmatpush3.bf16.msra.mxu0 %v2639_v35 }
  0x52   : > { %2089 = vmatprep.subr.bf16.mxu0 %v2391_v28  ;;  %2106 = vmatpush3.bf16.msra.mxu1 %v2630_v34 }
  0x53   : > { %2107 = vmatprep.subr.bf16.mxu1 %v2391_v28 }
  0x55   : > { %2090 = vmatpush3.bf16.msra.mxu0 %v2657_v36 }
  0x56   : > { %2108 = vmatpush3.bf16.msra.mxu1 %v2639_v35  ;;  %2091 = vmatprep.subr.bf16.mxu0 %v2391_v28 }
  0x57   : > { %2109 = vmatprep.subr.bf16.mxu1 %v2391_v28 }
  0x59   : > { %2092 = vmatpush3.bf16.msra.mxu0 %v2666_v37 }
  0x5a   : > { %2110 = vmatpush3.bf16.msra.mxu1 %v2657_v36  ;;  %2117 = vmatprep.subr.bf16.mxu0 %v2391_v28 }
  0x5b   : > { %2111 = vmatprep.subr.bf16.mxu1 %v2391_v28 }
  0x5e   : > { %2112 = vmatpush3.bf16.msra.mxu1 %v2666_v37 }
  0x5f   : > { %2137 = vmatprep.subr.bf16.mxu1 %v2391_v28 }
 0x10f   : > { %v751_v45 = vpop.f32.mrb[0].mxu0 }
 0x110   : > { %v752_v46 = vadd.f32 %v751_v45, %v577_v43  ;;  %v753_v47 = vpop.f32.mrb[1].mxu0 }
 0x111   : > { %v754_v48 = vadd.f32 %v753_v47, %v581_v44  ;;  %v755_v49 = vpop.f32.mrb[2].mxu0  ;;  %v584_v47 = vsub.s32 2, %v2676_v39 }
 0x112   : > { %v819_v50 = vmul.f32 0.17677669, %v752_v46  ;;  %v756_v51 = vadd.f32 %v755_v49, %v577_v43  ;;  %v757_v52 = vpop.f32.mrb[3].mxu0 }
 0x113   : > { %v758_v53 = vadd.f32 %v757_v52, %v581_v44 }
 0x114   : > { %v839_v54 = vmul.f32 %v819_v50, %v754_v48  ;;  %v820_v55 = vmul.f32 0.17677669, %v756_v51  ;;  %v2691_v7 = vpop.f32.mrb[0].mxu1 }
 0x115   : > { %v2693_v9 = vpop.f32.mrb[1].mxu1 }
 0x116   : > { %v840_v56 = vmul.f32 %v820_v55, %v758_v53  ;;  %v2695_v13 = vpop.f32.mrb[2].mxu1 }
 0x117   : > { %v761_v57 = vpop.f32.mrb[4].mxu0  ;;  %v2698_v15 = vpop.f32.mrb[3].mxu1 }
 0x118   : > { %v841_v58 = vpack.c.bf16 %v840_v56, %v839_v54  ;;  %v762_v59 = vadd.f32 %v761_v57, %v577_v43  ;;  %v763_v60 = vpop.f32.mrb[5].mxu0 }
 0x119   : > { %v764_v61 = vadd.f32 %v763_v60, %v581_v44  ;;  %v765_v62 = vpop.f32.mrb[6].mxu0 }
 0x11a   : > { %v821_v63 = vmul.f32 0.17677669, %v762_v59  ;;  %v766_v0 = vadd.f32 %v765_v62, %v577_v43  ;;  %v767_v1 = vpop.f32.mrb[7].mxu0  ;;  %2094 = vmatmul.mubr.bf16.vlgmr.msra.gmra.mrb[8].mxu0 %v841_v58 }
 0x11b   : > { %v931_v2 = vmul.f32 %v819_v50, %v764_v61  ;;  %v768_v3 = vadd.f32 %v767_v1, %v581_v44  ;;  %2118 = vmatpush3.bf16.msra.mxu0 %v2588_v26  ;;  %2133 = vmatprep.mubr.msk.bf16.mxu0 %vm2392_vm0, %v2391_v28 }
 0x11c   : > { %v1005_v4 = vmul.f32 %v821_v63, %v754_v48  ;;  %v1049_v5 = vmul.f32 %v821_v63, %v764_v61  ;;  %v822_v6 = vmul.f32 0.17677669, %v766_v0  ;;  %2119 = vmatprep.subr.bf16.mxu0 %v2391_v28  ;;  %v585_v48 = vrot.slane %v2682_v41, %v584_v47 }
 0x11d   : > { %v932_v8 = vmul.f32 %v820_v55, %v768_v3 }
 0x11e   : > { %v1006_v10 = vmul.f32 %v822_v6, %v758_v53  ;;  %v1050_v12 = vmul.f32 %v822_v6, %v768_v3  ;;  %v805_v49 = vadd.f32 %v2693_v9, %v585_v48  ;;  %v813_v51 = vadd.f32 %v2691_v7, %v585_v48 }
 0x11f   : > { %v933_v14 = vpack.c.bf16 %v932_v8, %v931_v2  ;;  %2120 = vmatpush3.bf16.msra.mxu0 %v2597_v29  ;;  %v808_v53 = vadd.f32 %v2698_v15, %v585_v48  ;;  %v816_v56 = vadd.f32 %v2695_v13, %v585_v48 }
 0x120   : > { %v1007_v16 = vpack.c.bf16 %v1006_v10, %v1005_v4  ;;  %v1051_v17 = vpack.c.bf16 %v1050_v12, %v1049_v5  ;;  %2121 = vmatprep.subr.bf16.mxu0 %v2391_v28 }
 0x121   : > { %2114 = vmatmul.mubr.bf16.vlgmr.msra.gmra.mrb[4].mxu1 %v933_v14 }
 0x122   : > { %2138 = vmatpush3.bf16.msra.mxu1 %v2588_v26  ;;  %2153 = vmatprep.mubr.msk.bf16.mxu1 %vm2392_vm0, %v2391_v28 }
 0x123   : > { %2122 = vmatpush3.bf16.msra.mxu0 %v2612_v32  ;;  %2139 = vmatprep.subr.bf16.mxu1 %v2391_v28 }
 0x124   : > { %2123 = vmatprep.subr.bf16.mxu0 %v2391_v28 }
 0x126   : > { %2140 = vmatpush3.bf16.msra.mxu1 %v2597_v29 }
 0x127   : > { %2124 = vmatpush3.bf16.msra.mxu0 %v2619_v33  ;;  %2141 = vmatprep.subr.bf16.mxu1 %v2391_v28 }
 0x128   : > { %2125 = vmatprep.subr.bf16.mxu0 %v2391_v28 }
 0x12a   : > { %2142 = vmatpush3.bf16.msra.mxu1 %v2612_v32 }
 0x12b   : > { %2126 = vmatpush3.bf16.msra.mxu0 %v2630_v34  ;;  %2143 = vmatprep.subr.bf16.mxu1 %v2391_v28 }
 0x12c   : > { %2127 = vmatprep.subr.bf16.mxu0 %v2391_v28 }
 0x12e   : > { %2144 = vmatpush3.bf16.msra.mxu1 %v2619_v33 }
 0x12f   : > { %2128 = vmatpush3.bf16.msra.mxu0 %v2639_v35  ;;  %2145 = vmatprep.subr.bf16.mxu1 %v2391_v28 }
 0x130   : > { %2129 = vmatprep.subr.bf16.mxu0 %v2391_v28 }
 0x132   : > { %2146 = vmatpush3.bf16.msra.mxu1 %v2630_v34 }
 0x133   : > { %2130 = vmatpush3.bf16.msra.mxu0 %v2657_v36  ;;  %2147 = vmatprep.subr.bf16.mxu1 %v2391_v28 }
 0x134   : > { %2131 = vmatprep.subr.bf16.mxu0 %v2391_v28 }
 0x136   : > { %2148 = vmatpush3.bf16.msra.mxu1 %v2639_v35 }
 0x137   : > { %2132 = vmatpush3.bf16.msra.mxu0 %v2666_v37  ;;  %2149 = vmatprep.subr.bf16.mxu1 %v2391_v28 }
 0x138   : > { %2157 = vmatprep.subr.bf16.mxu0 %v2286_v18 }
 0x13a   : > { %2134 = vmatmul.mubr.bf16.vlgmr.msra.gmra.mrb[12].mxu0 %v1007_v16  ;;  %2150 = vmatpush3.bf16.msra.mxu1 %v2657_v36 }
 0x13b   : > { %2151 = vmatprep.subr.bf16.mxu1 %v2391_v28  ;;  %2158 = vmatpush3.bf16.msra.mxu0 %v2286_v18 }
 0x13c   : > { %2159 = vmatprep.subr.bf16.mxu0 %v2287_v19 }
 0x13e   : > { %2152 = vmatpush3.bf16.msra.mxu1 %v2666_v37 }
 0x13f   : > { %2160 = vmatpush3.bf16.msra.mxu0 %v2287_v19 }
 0x140   : > { %2161 = vmatprep.subr.bf16.mxu0 %v2288_v20 }
 0x141   : > { %2154 = vmatmul.mubr.bf16.vlgmr.msra.gmra.mrb[8].mxu1 %v1051_v17 }
 0x143   : > { %2162 = vmatpush3.bf16.msra.mxu0 %v2288_v20 }
 0x144   : > { %2163 = vmatprep.subr.bf16.mxu0 %v2289_v21 }
 0x147   : > { %2164 = vmatpush3.bf16.msra.mxu0 %v2289_v21 }
 0x148   : > { %2165 = vmatprep.subr.bf16.mxu0 %v2290_v22 }
 0x14b   : > { %2166 = vmatpush3.bf16.msra.mxu0 %v2290_v22 }
 0x14c   : > { %2167 = vmatprep.subr.bf16.mxu0 %v2291_v23 }
 0x14f   : > { %2168 = vmatpush3.bf16.msra.mxu0 %v2291_v23 }
 0x150   : > { %2169 = vmatprep.subr.bf16.mxu0 %v2292_v24 }
 0x153   : > { %2170 = vmatpush3.bf16.msra.mxu0 %v2292_v24 }
 0x154   : > { %2171 = vmatprep.subr.bf16.mxu0 %v2293_v25 }
 0x157   : > { %2172 = vmatpush3.bf16.msra.mxu0 %v2293_v25 }
 0x1ed   : > { %v924_v26 = vpop.f32.mrb[8].mxu0 }
 0x1ee   : > { %v2095_v27 = vpop.f32.mrb[9].mxu0 }
 0x1ef   : > { %v927_v28 = vpop.f32.mrb[10].mxu0 }
 0x1f0   : > { %v2096_v29 = vpop.f32.mrb[11].mxu0 }
 0x1f4   : > { %v968_v30 = vpop.f32.mrb[4].mxu1 }
 0x1f5   : > { %v975_v32 = vmax.f32 %v924_v26, %v968_v30  ;;  %v2115_v33 = vpop.f32.mrb[5].mxu1 }
 0x1f6   : > { %v971_v34 = vpop.f32.mrb[6].mxu1 }
 0x1f7   : > { %v977_v35 = vsub.f32 %v924_v26, %v975_v32  ;;  %v989_v36 = vsub.f32 %v968_v30, %v975_v32  ;;  %v976_v37 = vmax.f32 %v927_v28, %v971_v34  ;;  %v2116_v38 = vpop.f32.mrb[7].mxu1 }
 0x1f9   : > { %v979_v40 = vmul.f32 1.442695, %v977_v35  ;;  %v991_v42 = vmul.f32 1.442695, %v989_v36  ;;  %v978_v43 = vsub.f32 %v927_v28, %v976_v37  ;;  %v990_v44 = vsub.f32 %v971_v34, %v976_v37 }
 0x1fb   : > { %2310 = vpow2.f32 %v979_v40  ;;  %v981_v45 = vmul.f32 1.442695, %v978_v43  ;;  %v993_v46 = vmul.f32 1.442695, %v990_v44  ;;  %v1922_v43 = vld [vmem:[%s2902_s4] ss:$0 sm:$0xff]  ;;  %v538_v44 = vunpack.c.l.bf16 %v2606_v31 }
 0x1fc   : > { %2312 = vpow2.f32 %v991_v42 }
 0x1fd   : > { %2314 = vpow2.f32 %v981_v45 }
 0x1fe   : > { %2316 = vpow2.f32 %v993_v46  ;;  %v536_v46 = vunpack.c.l.bf16 %v2540_v11 }
 0x205   : > { %v2311_v50 = vpop.eup %2310 }
 0x206   : > { %v2313_v52 = vpop.eup %2312  ;;  %v985_v54 = vmul.f32 %v2311_v50, %v805_v49 }
 0x207   : > { %v2315_v55 = vpop.eup %2314  ;;  %v995_v57 = vadd.f32 %v2313_v52, %v2311_v50  ;;  %v997_v58 = vmul.f32 %v2313_v52, %v813_v51 }
 0x208   : > { %v2317_v39 = vpop.eup %2316  ;;  %v986_v59 = vmul.f32 %v2315_v55, %v808_v53 }
 0x209   : > { %2318 = vrcp.f32 %v995_v57  ;;  %v996_v60 = vadd.f32 %v2317_v39, %v2315_v55  ;;  %v998_v61 = vmul.f32 %v2317_v39, %v816_v56  ;;  %v999_v41 = vadd.f32 %v997_v58, %v985_v54 }
 0x20a   : > { %v539_v54 = vunpack.c.h.bf16 %v2606_v31  ;;  %v537_v57 = vunpack.c.h.bf16 %v2540_v11 }
 0x20b   : > { %2320 = vrcp.f32 %v996_v60  ;;  %v1000_v62 = vadd.f32 %v998_v61, %v986_v59  ;;  %v2294_v59 = vld [vmem:[%s2906_s8] sm:$0xff]  }
 0x20c   : > { %2177 = vmatprep.subr.bf16.mxu1 %v2294_v59 }
 0x20d   : > { %v1042_v63 = vpop.f32.mrb[12].mxu0  ;;  %2178 = vmatpush3.bf16.msra.mxu1 %v2294_v59  ;;  %v1933_v59 = vld [vmem:[%s2907_s9] ss:$0 sm:$0xff] }
 0x20e   : > { %v2135_v0 = vpop.f32.mrb[13].mxu0 }
 0x20f   : > { %v1045_v1 = vpop.f32.mrb[14].mxu0 }
 0x210   : > { %v2136_v2 = vpop.f32.mrb[15].mxu0 }
 0x213   : > { %v2319_v3 = vpop.eup %2318 }
 0x214   : > { %v1086_v4 = vpop.f32.mrb[8].mxu1  ;;  %v1003_v5 = vmul.f32 %v2319_v3, %v999_v41 }
 0x215   : > { %v2321_v6 = vpop.eup %2320  ;;  %v1093_v7 = vmax.f32 %v1042_v63, %v1086_v4  ;;  %v2155_v8 = vpop.f32.mrb[9].mxu1 }
 0x216   : > { %v1089_v9 = vpop.f32.mrb[10].mxu1  ;;  %v1004_v10 = vmul.f32 %v2321_v6, %v1000_v62 }
 0x217   : > { %v1095_v12 = vsub.f32 %v1042_v63, %v1093_v7  ;;  %v1107_v13 = vsub.f32 %v1086_v4, %v1093_v7  ;;  %v1094_v14 = vmax.f32 %v1045_v1, %v1089_v9  ;;  %v2156_v15 = vpop.f32.mrb[11].mxu1 }
 0x218   : > { %v1123_v16 = vpack.c.bf16 %v1004_v10, %v1003_v5  ;;  %v2296_v10 = vld [vmem:[%s2906_s8 + $0x10] sm:$0xff]  }
 0x219   : > { %v1097_v17 = vmul.f32 1.442695, %v1095_v12  ;;  %v1109_v18 = vmul.f32 1.442695, %v1107_v13  ;;  %v1096_v19 = vsub.f32 %v1045_v1, %v1094_v14  ;;  %v1108_v20 = vsub.f32 %v1089_v9, %v1094_v14  ;;  %v2295_v9 = vld [vmem:[%s2906_s8 + $0x8] sm:$0xff]   ;;  %v2297_v12 = vld [vmem:[%s2906_s8 + $0x18] sm:$0xff]  }
 0x21a   : > { %2173 = vmatprep.mubr.bf16.mxu0 %v1123_v16  ;;  %2179 = vmatprep.subr.bf16.mxu1 %v2295_v9  ;;  %v2298_v13 = vld [vmem:[%s2906_s8 + $0x20] sm:$0xff]   ;;  %v2299_v14 = vld [vmem:[%s2906_s8 + $0x28] sm:$0xff]   ;;  %v2300_v15 = vld [vmem:[%s2906_s8 + $0x30] sm:$0xff]  }
 0x21b   : > { %2322 = vpow2.f32 %v1097_v17  ;;  %v1099_v21 = vmul.f32 1.442695, %v1096_v19  ;;  %v1111_v22 = vmul.f32 1.442695, %v1108_v20  ;;  %2180 = vmatpush3.bf16.msra.mxu1 %v2295_v9  ;;  %v2301_v16 = vld [vmem:[%s2906_s8 + $0x38] sm:$0xff]  }
 0x21c   : > { %2324 = vpow2.f32 %v1109_v18  ;;  %2181 = vmatprep.subr.bf16.mxu1 %v2296_v10 }
 0x21d   : > { %2326 = vpow2.f32 %v1099_v21 }
 0x21e   : > { %2328 = vpow2.f32 %v1111_v22 }
 0x21f   : > { %2182 = vmatpush3.bf16.msra.mxu1 %v2296_v10 }
 0x220   : > { %2183 = vmatprep.subr.bf16.mxu1 %v2297_v12 }
 0x223   : > { %2184 = vmatpush3.bf16.msra.mxu1 %v2297_v12 }
 0x224   : > { %2185 = vmatprep.subr.bf16.mxu1 %v2298_v13 }
 0x225   : > { %v2323_v23 = vpop.eup %2322 }
 0x226   : > { %v2325_v24 = vpop.eup %2324  ;;  %v1103_v25 = vmul.f32 %v2323_v23, %v805_v49 }
 0x227   : > { %v2327_v26 = vpop.eup %2326  ;;  %v1113_v27 = vadd.f32 %v2325_v24, %v2323_v23  ;;  %v1115_v28 = vmul.f32 %v2325_v24, %v813_v51  ;;  %2186 = vmatpush3.bf16.msra.mxu1 %v2298_v13 }
 0x228   : > { %v2329_v29 = vpop.eup %2328  ;;  %v1104_v30 = vmul.f32 %v2327_v26, %v808_v53  ;;  %2187 = vmatprep.subr.bf16.mxu1 %v2299_v14 }
 0x229   : > { %2330 = vrcp.f32 %v1113_v27  ;;  %v1114_v32 = vadd.f32 %v2329_v29, %v2327_v26  ;;  %v1116_v33 = vmul.f32 %v2329_v29, %v816_v56  ;;  %v1117_v34 = vadd.f32 %v1115_v28, %v1103_v25 }
 0x22b   : > { %2332 = vrcp.f32 %v1114_v32  ;;  %v1118_v35 = vadd.f32 %v1116_v33, %v1104_v30  ;;  %2188 = vmatpush3.bf16.msra.mxu1 %v2299_v14  ;;  %v1931_v32 = vld [vmem:[%s2904_s6] ss:$0 sm:$0xff] }
 0x22c   : > { %2189 = vmatprep.subr.bf16.mxu1 %v2300_v15 }
 0x22f   : > { %2190 = vmatpush3.bf16.msra.mxu1 %v2300_v15 }
 0x230   : > { %2191 = vmatprep.subr.bf16.mxu1 %v2301_v16 }
 0x233   : > { %v2331_v36 = vpop.eup %2330  ;;  %2192 = vmatpush3.bf16.msra.mxu1 %v2301_v16 }
 0x234   : > { %v1121_v37 = vmul.f32 %v2331_v36, %v1117_v34 }
 0x235   : > { %v2333_v38 = vpop.eup %2332 }
 0x236   : > { %v1122_v40 = vmul.f32 %v2333_v38, %v1118_v35  ;;  %v1932_v38 = vld [vmem:[%s2905_s7] ss:$0 sm:$0xff] }
 0x238   : > { %v1124_v42 = vpack.c.bf16 %v1122_v40, %v1121_v37 }
 0x23a   : > { %2174 = vmatmul.mubr.bf16.vlgmr.msra.gmra.mrb[16].mxu0 %v1124_v42 }
 0x30d   : > { %v2175_v45 = vpop.f32.mrb[16].mxu0 }
 0x30e   : > { %v1239_v47 = vadd.f32 %v2175_v45, %v1922_v43  ;;  %v1230_v48 = vpop.f32.mrb[17].mxu0 }
 0x30f   : > { %v1231_v49 = vadd.f32 %v1922_v43, %v1230_v48  ;;  %v2176_v50 = vpop.f32.mrb[18].mxu0 }
 0x310   : > { %v1242_v51 = vadd.f32 %v2176_v50, %v1922_v43  ;;  %v1233_v52 = vpop.f32.mrb[19].mxu0  ;;  %v1247_v53 = vadd.f32 %v1239_v47, %v538_v44 }
 0x311   : > { %v1234_v55 = vadd.f32 %v1922_v43, %v1233_v52  ;;  %v1245_v56 = vadd.f32 %v1231_v49, %v536_v46  ;;  %v2302_v52 = vld [vmem:[%s2908_s10] sm:$0xff]  }
 0x312   : > { %1255 = vadd.xlane.f32.xlu1 %v1247_v53  ;;  %v1248_v58 = vadd.f32 %v1242_v51, %v539_v54  ;;  %2197 = vmatprep.subr.bf16.mxu0 %v2302_v52  ;;  %v2304_v54 = vld [vmem:[%s2908_s10 + $0x10] sm:$0xff]  }
 0x313   : > { %1251 = vadd.xlane.f32.xlu0 %v1245_v56  ;;  %v1246_v39 = vadd.f32 %v1234_v55, %v537_v57  ;;  %2198 = vmatpush3.bf16.msra.mxu0 %v2302_v52  ;;  %v2305_v55 = vld [vmem:[%s2908_s10 + $0x18] sm:$0xff]   ;;  %v2307_v57 = vld [vmem:[%s2908_s10 + $0x28] sm:$0xff]  }
 0x316   : > { %1257 = vadd.xlane.f32.xlu1 %v1248_v58 }
 0x317   : > { %1253 = vadd.xlane.f32.xlu0 %v1246_v39 }
 0x39f   : > { %v1256_v60 = vpop.xlane.xlu1 %1255 }
 0x3a0   : > { %v1252_v61 = vpop.xlane.xlu0 %1251  ;;  %v1262_v41 = vmul.f32 0.0078125, %v1256_v60 }
 0x3a1   : > { %v1260_v31 = vmul.f32 0.0078125, %v1252_v61 }
 0x3a2   : > { %v1266_v11 = vsub.f32 %v1247_v53, %v1262_v41  ;;  %v2303_v53 = vld [vmem:[%s2908_s10 + $0x8] sm:$0xff]  }
 0x3a3   : > { %v1264_v62 = vsub.f32 %v1245_v56, %v1260_v31  ;;  %v1258_v63 = vpop.xlane.xlu1 %1257  ;;  %2199 = vmatprep.subr.bf16.mxu0 %v2303_v53  ;;  %v2306_v56 = vld [vmem:[%s2908_s10 + $0x20] sm:$0xff]  }
 0x3a4   : > { %v1254_v0 = vpop.xlane.xlu0 %1253  ;;  %v1263_v1 = vmul.f32 0.0078125, %v1258_v63  ;;  %v1270_v6 = vmul.f32 %v1266_v11, %v1266_v11  ;;  %2200 = vmatpush3.bf16.msra.mxu0 %v2303_v53 }
 0x3a5   : > { %v1261_v2 = vmul.f32 0.0078125, %v1254_v0  ;;  %v1268_v3 = vmul.f32 %v1264_v62, %v1264_v62  ;;  %2201 = vmatprep.subr.bf16.mxu0 %v2304_v54 }
 0x3a6   : > { %v1267_v5 = vsub.f32 %v1248_v58, %v1263_v1  ;;  %v2308_v58 = vld [vmem:[%s2908_s10 + $0x30] sm:$0xff]  }
 0x3a7   : > { %v1265_v4 = vsub.f32 %v1246_v39, %v1261_v2  ;;  %1272 = vadd.xlane.f32.xlu0 %v1268_v3  ;;  %v2309_v39 = vld [vmem:[%s2908_s10 + $0x38] sm:$0xff]  }
 0x3a8   : > { %v1271_v8 = vmul.f32 %v1267_v5, %v1267_v5  ;;  %2202 = vmatpush3.bf16.msra.mxu0 %v2304_v54 }
 0x3a9   : > { %v1269_v7 = vmul.f32 %v1265_v4, %v1265_v4  ;;  %2203 = vmatprep.subr.bf16.mxu0 %v2305_v55 }
 0x3ab   : > { %1276 = vadd.xlane.f32.xlu0 %v1270_v6  ;;  %1274 = vadd.xlane.f32.xlu1 %v1269_v7 }
 0x3ac   : > { %2204 = vmatpush3.bf16.msra.mxu0 %v2305_v55 }
 0x3ad   : > { %2205 = vmatprep.subr.bf16.mxu0 %v2306_v56 }
 0x3af   : > { %1278 = vadd.xlane.f32.xlu1 %v1271_v8 }
 0x3b0   : > { %2206 = vmatpush3.bf16.msra.mxu0 %v2306_v56 }
 0x3b1   : > { %2207 = vmatprep.subr.bf16.mxu0 %v2307_v57 }
 0x3b4   : > { %2208 = vmatpush3.bf16.msra.mxu0 %v2307_v57 }
 0x3b5   : > { %2209 = vmatprep.subr.bf16.mxu0 %v2308_v58 }
 0x3b8   : > { %2210 = vmatpush3.bf16.msra.mxu0 %v2308_v58 }
 0x3b9   : > { %2211 = vmatprep.subr.bf16.mxu0 %v2309_v39 }
 0x3bc   : > { %2212 = vmatpush3.bf16.msra.mxu0 %v2309_v39 }
 0x434   : > { %v1273_v17 = vpop.xlane.xlu0 %1272 }
 0x435   : > { %v1280_v18 = vmul.f32 0.0078125, %v1273_v17 }
 0x437   : > { %v1284_v19 = vadd.f32 1e-05, %v1280_v18 }
 0x438   : > { %v1275_v20 = vpop.xlane.xlu1 %1274  ;;  %v1277_v21 = vpop.xlane.xlu0 %1276 }
 0x439   : > { %2334 = vrsqrt.f32 %v1284_v19  ;;  %v1281_v22 = vmul.f32 0.0078125, %v1275_v20  ;;  %v1282_v23 = vmul.f32 0.0078125, %v1277_v21 }
 0x43b   : > { %v1285_v24 = vadd.f32 1e-05, %v1281_v22  ;;  %v1286_v25 = vadd.f32 1e-05, %v1282_v23 }
 0x43c   : > { %v1279_v26 = vpop.xlane.xlu1 %1278 }
 0x43d   : > { %2336 = vrsqrt.f32 %v1285_v24  ;;  %v1283_v27 = vmul.f32 0.0078125, %v1279_v26 }
 0x43e   : > { %2338 = vrsqrt.f32 %v1286_v25 }
 0x43f   : > { %v1287_v28 = vadd.f32 1e-05, %v1283_v27 }
 0x441   : > { %2340 = vrsqrt.f32 %v1287_v28 }
 0x443   : > { %v2335_v29 = vpop.eup %2334 }
 0x444   : > { %v1292_v30 = vmul.f32 %v2335_v29, %v1264_v62 }
 0x446   : > { %v1302_v36 = vmul.f32 %v1931_v32, %v1292_v30 }
 0x447   : > { %v2337_v33 = vpop.eup %2336 }
 0x448   : > { %v2339_v34 = vpop.eup %2338  ;;  %v1293_v35 = vmul.f32 %v2337_v33, %v1265_v4  ;;  %v2796_v44 = vadd.f32 %v1932_v38, %v1302_v36 }
 0x449   : > { %v1294_v37 = vmul.f32 %v2339_v34, %v1266_v11 }
 0x44a   : > { %v1303_v40 = vmul.f32 %v1931_v32, %v1293_v35 }
 0x44b   : > { %v2341_v42 = vpop.eup %2340  ;;  %v1304_v46 = vmul.f32 %v1931_v32, %v1294_v37 }
 0x44c   : > { %v1295_v43 = vmul.f32 %v2341_v42, %v1267_v5  ;;  %v2798_v45 = vadd.f32 %v1932_v38, %v1303_v40 }
 0x44d   : > { %v2802_v49 = vadd.f32 %v1932_v38, %v1304_v46 }
 0x44e   : > { %v1316_v47 = vpack.c.bf16 %v2798_v45, %v2796_v44  ;;  %v1305_v48 = vmul.f32 %v1931_v32, %v1295_v43 }
 0x450   : > { %2193 = vmatprep.mubr.bf16.mxu1 %v1316_v47  ;;  %v2804_v50 = vadd.f32 %v1932_v38, %v1305_v48 }
 0x452   : > { %v1317_v51 = vpack.c.bf16 %v2804_v50, %v2802_v49 }
 0x454   : > { %2194 = vmatmul.mubr.bf16.vlgmr.msra.gmra.mrb[12].mxu1 %v1317_v51 }
 0x527   : > { %v2195_v60 = vpop.f32.mrb[12].mxu1 }
 0x528   : > { %v2835_v61 = vadd.f32 %v2195_v60, %v1933_v59  ;;  %v1423_v41 = vpop.f32.mrb[13].mxu1 }
 0x529   : > { %v2837_v31 = vadd.f32 %v1933_v59, %v1423_v41  ;;  %v2196_v62 = vpop.f32.mrb[14].mxu1 }
 0x52a   : > { %v2840_v63 = vmul.f32 0.70710677, %v2835_v61  ;;  %v2842_v0 = vadd.f32 %v2196_v62, %v1933_v59  ;;  %v1426_v11 = vpop.f32.mrb[15].mxu1 }
 0x52b   : > { %v2845_v1 = vmul.f32 0.70710677, %v2837_v31  ;;  %v2847_v2 = vadd.f32 %v1933_v59, %v1426_v11 }
 0x52c   : > { %v1444_v3 = vand.u32 2147483647, %v2840_v63  ;;  %v2851_v4 = vmul.f32 0.70710677, %v2842_v0  ;;  %vm1524_vm1 = vcmp.ge.f32.partialorder %v2840_v63, 0.0 }
 0x52d   : > { %v1442_v5 = vand.u32 2147483647, %v2845_v1  ;;  %v2855_v6 = vmul.f32 0.70710677, %v2847_v2  ;;  %vm1522_vm2 = vcmp.ge.f32.partialorder %v2845_v1, 0.0 }
 0x52e   : > { %v1448_v7 = vmul.f32 0.3275911, %v1444_v3  ;;  %v1445_v8 = vand.u32 2147483647, %v2851_v4  ;;  %v1500_v18 = vsub.f32 0.0, %v1444_v3  ;;  %vm1525_vm3 = vcmp.ge.f32.partialorder %v2851_v4, 0.0 }
 0x52f   : > { %v1446_v9 = vmul.f32 0.3275911, %v1442_v5  ;;  %v1443_v10 = vand.u32 2147483647, %v2855_v6  ;;  %v1498_v19 = vsub.f32 0.0, %v1442_v5  ;;  %vm1523_vm4 = vcmp.ge.f32.partialorder %v2855_v6, 0.0 }
 0x530   : > { %v1452_v12 = vadd.f32 1.0, %v1448_v7  ;;  %v1449_v13 = vmul.f32 0.3275911, %v1445_v8  ;;  %v1504_v21 = vmul.f32 %v1500_v18, %v1444_v3  ;;  %v1501_v22 = vsub.f32 0.0, %v1445_v8 }
 0x531   : > { %v1450_v14 = vadd.f32 1.0, %v1446_v9  ;;  %v1447_v15 = vmul.f32 0.3275911, %v1443_v10  ;;  %v1502_v25 = vmul.f32 %v1498_v19, %v1442_v5  ;;  %v1499_v27 = vsub.f32 0.0, %v1443_v10 }
 0x532   : > { %2342 = vrcp.f32 %v1452_v12  ;;  %v1453_v16 = vadd.f32 1.0, %v1449_v13  ;;  %v1510_v30 = vmul.f32 1.442695, %v1504_v21  ;;  %v1505_v33 = vmul.f32 %v1501_v22, %v1445_v8 }
 0x533   : > { %2344 = vrcp.f32 %v1450_v14  ;;  %v1451_v17 = vadd.f32 1.0, %v1447_v15  ;;  %v1506_v35 = vmul.f32 1.442695, %v1502_v25  ;;  %v1503_v40 = vmul.f32 %v1499_v27, %v1443_v10 }
 0x534   : > { %2346 = vrcp.f32 %v1453_v16  ;;  %v1512_v48 = vmul.f32 1.442695, %v1505_v33 }
 0x535   : > { %2348 = vrcp.f32 %v1451_v17  ;;  %v1508_v55 = vmul.f32 1.442695, %v1503_v40 }
 0x536   : > { %2350 = vpow2.f32 %v1510_v30 }
 0x537   : > { %2352 = vpow2.f32 %v1506_v35 }
 0x538   : > { %2354 = vpow2.f32 %v1512_v48 }
 0x539   : > { %2356 = vpow2.f32 %v1508_v55 }
 0x53c   : > { %v2343_v20 = vpop.eup %2342 }
 0x53d   : > { %v2345_v23 = vpop.eup %2344  ;;  %v1464_v24 = vmul.f32 1.0614054, %v2343_v20 }
 0x53e   : > { %v1462_v26 = vmul.f32 1.0614054, %v2345_v23  ;;  %v2347_v29 = vpop.eup %2346 }
 0x53f   : > { %v1468_v28 = vadd.f32 -1.4531521, %v1464_v24  ;;  %v1465_v36 = vmul.f32 1.0614054, %v2347_v29  ;;  %v2349_v37 = vpop.eup %2348 }
 0x540   : > { %v1466_v32 = vadd.f32 -1.4531521, %v1462_v26  ;;  %v1463_v46 = vmul.f32 1.0614054, %v2349_v37  ;;  %v2351_v12 = vpop.eup %2350 }
 0x541   : > { %v1472_v34 = vmul.f32 %v2343_v20, %v1468_v28  ;;  %v1469_v43 = vadd.f32 -1.4531521, %v1465_v36  ;;  %v2353_v14 = vpop.eup %2352 }
 0x542   : > { %v1470_v38 = vmul.f32 %v2345_v23, %v1466_v32  ;;  %v1467_v53 = vadd.f32 -1.4531521, %v1463_v46  ;;  %v2355_v24 = vpop.eup %2354  ;;  %v1534_v46 = vmul.f32 0.5, %v2837_v31 }
 0x543   : > { %v1476_v42 = vadd.f32 1.4214138, %v1472_v34  ;;  %v1473_v52 = vmul.f32 %v2347_v29, %v1469_v43  ;;  %v2357_v30 = vpop.eup %2356  ;;  %v1537_v43 = vmul.f32 0.5, %v2842_v0  ;;  %v1942_v0 = vld [vmem:[%s2909_s11] ss:$0 sm:$0xff] }
 0x544   : > { %v1474_v47 = vadd.f32 1.4214138, %v1470_v38  ;;  %v1471_v58 = vmul.f32 %v2349_v37, %v1467_v53 }
 0x545   : > { %v1480_v51 = vmul.f32 %v2343_v20, %v1476_v42  ;;  %v1477_v57 = vadd.f32 1.4214138, %v1473_v52 }
 0x546   : > { %v1478_v54 = vmul.f32 %v2345_v23, %v1474_v47  ;;  %v1475_v41 = vadd.f32 1.4214138, %v1471_v58 }
 0x547   : > { %v1484_v56 = vadd.f32 -0.28449672, %v1480_v51  ;;  %v1481_v60 = vmul.f32 %v2347_v29, %v1477_v57  ;;  %v1535_v51 = vmul.f32 0.5, %v2847_v2 }
 0x548   : > { %v1482_v39 = vadd.f32 -0.28449672, %v1478_v54  ;;  %v1479_v5 = vmul.f32 %v2349_v37, %v1475_v41 }
 0x549   : > { %v1488_v59 = vmul.f32 %v2343_v20, %v1484_v56  ;;  %v1485_v3 = vadd.f32 -0.28449672, %v1481_v60 }
 0x54a   : > { %v1486_v62 = vmul.f32 %v2345_v23, %v1482_v39  ;;  %v1483_v10 = vadd.f32 -0.28449672, %v1479_v5 }
 0x54b   : > { %v1492_v11 = vadd.f32 0.2548296, %v1488_v59  ;;  %v1489_v9 = vmul.f32 %v2347_v29, %v1485_v3 }
 0x54c   : > { %v1490_v7 = vadd.f32 0.2548296, %v1486_v62  ;;  %v1487_v17 = vmul.f32 %v2349_v37, %v1483_v10 }
 0x54d   : > { %v1496_v8 = vmul.f32 %v2343_v20, %v1492_v11  ;;  %v1493_v16 = vadd.f32 0.2548296, %v1489_v9 }
 0x54e   : > { %v1494_v13 = vmul.f32 %v2345_v23, %v1490_v7  ;;  %v1491_v22 = vadd.f32 0.2548296, %v1487_v17 }
 0x54f   : > { %v1516_v15 = vmul.f32 %v2351_v12, %v1496_v8  ;;  %v1497_v21 = vmul.f32 %v2347_v29, %v1493_v16  ;;  %v1536_v29 = vmul.f32 0.5, %v2835_v61 }
 0x550   : > { %v1514_v18 = vmul.f32 %v2353_v14, %v1494_v13  ;;  %v1495_v28 = vmul.f32 %v2349_v37, %v1491_v22 }
 0x551   : > { %v1520_v19 = vsub.f32 1.0, %v1516_v15  ;;  %v1517_v27 = vmul.f32 %v2355_v24, %v1497_v21 }
 0x552   : > { %v1518_v25 = vsub.f32 1.0, %v1514_v18  ;;  %v1515_v23 = vmul.f32 %v2357_v30, %v1495_v28 }
 0x553   : > { %v1528_v26 = vsub.f32 0.0, %v1520_v19  ;;  %v1521_v33 = vsub.f32 1.0, %v1517_v27 }
 0x554   : > { %v1526_v20 = vsub.f32 0.0, %v1518_v25  ;;  %v1519_v36 = vsub.f32 1.0, %v1515_v23 }
 0x555   : > { %v1532_v32 = vsel %vm1524_vm1, %v1520_v19, %v1528_v26  ;;  %v1529_v35 = vsub.f32 0.0, %v1521_v33 }
 0x556   : > { %v1530_v34 = vsel %vm1522_vm2, %v1518_v25, %v1526_v20  ;;  %v1540_v38 = vadd.f32 1.0, %v1532_v32  ;;  %v1527_v42 = vsub.f32 0.0, %v1519_v36 }
 0x557   : > { %v1533_v40 = vsel %vm1525_vm3, %v1521_v33, %v1529_v35  ;;  %v1538_v37 = vadd.f32 1.0, %v1530_v34  ;;  %v1951_v33 = vld [vmem:[%s2910_s12] ss:$0 sm:$0xff] }
 0x558   : > { %v1541_v63 = vadd.f32 1.0, %v1533_v40  ;;  %v1531_v47 = vsel %vm1523_vm4, %v1519_v36, %v1527_v42  ;;  %v1544_v1 = vmul.f32 %v1540_v38, %v1536_v29  ;;  %v1952_v29 = vld [vmem:[%s2911_s13] ss:$0 sm:$0xff] }
 0x559   : > { %v1539_v52 = vadd.f32 1.0, %v1531_v47  ;;  %v1542_v53 = vmul.f32 %v1538_v37, %v1534_v46 }
 0x55a   : > { %v1545_v48 = vmul.f32 %v1541_v63, %v1537_v43 }
 0x55b   : > { %v1543_v54 = vmul.f32 %v1539_v52, %v1535_v51 }
 0x55c   : > { %v1547_v4 = vpack.c.bf16 %v1545_v48, %v1544_v1 }
 0x55d   : > { %v1546_v61 = vpack.c.bf16 %v1543_v54, %v1542_v53 }
 0x55f   : > { %2213 = vmatprep.mubr.bf16.mxu0 %v1546_v61 }
 0x560   : > { %2214 = vmatmul.mubr.bf16.vlgmr.msra.gmra.mrb[20].mxu0 %v1547_v4 }
 0x633   : > { %v2215_v55 = vpop.f32.mrb[20].mxu0 }
 0x634   : > { %v1653_v6 = vpop.f32.mrb[21].mxu0  ;;  %v1662_v58 = vadd.f32 %v2215_v55, %v1942_v0 }
 0x635   : > { %v1654_v56 = vadd.f32 %v1942_v0, %v1653_v6  ;;  %v2216_v31 = vpop.f32.mrb[22].mxu0 }
 0x636   : > { %v1656_v57 = vpop.f32.mrb[23].mxu0  ;;  %v1665_v59 = vadd.f32 %v2216_v31, %v1942_v0  ;;  %v1670_v41 = vadd.f32 %v1662_v58, %v2802_v49 }
 0x637   : > { %v1657_v39 = vadd.f32 %v1942_v0, %v1656_v57  ;;  %v1668_v2 = vadd.f32 %v1654_v56, %v2796_v44 }
 0x638   : > { %v1671_v62 = vadd.f32 %v1665_v59, %v2804_v50 }
 0x639   : > { %1674 = vadd.xlane.f32.xlu0 %v1668_v2  ;;  %v1669_v60 = vadd.f32 %v1657_v39, %v2798_v45 }
 0x63b   : > { %1676 = vadd.xlane.f32.xlu1 %v1669_v60 }
 0x63d   : > { %1678 = vadd.xlane.f32.xlu0 %v1670_v41 }
 0x63f   : > { %1680 = vadd.xlane.f32.xlu1 %v1671_v62 }
 0x6c6   : > { %v1675_v11 = vpop.xlane.xlu0 %1674 }
 0x6c7   : > { %v1682_v3 = vmul.f32 0.0078125, %v1675_v11 }
 0x6c8   : > { %v1677_v5 = vpop.xlane.xlu1 %1676 }
 0x6c9   : > { %v1686_v7 = vsub.f32 %v1668_v2, %v1682_v3  ;;  %v1683_v8 = vmul.f32 0.0078125, %v1677_v5 }
 0x6ca   : > { %v1679_v9 = vpop.xlane.xlu0 %1678 }
 0x6cb   : > { %v1687_v10 = vsub.f32 %v1669_v60, %v1683_v8  ;;  %v1684_v12 = vmul.f32 0.0078125, %v1679_v9  ;;  %v1690_v44 = vmul.f32 %v1686_v7, %v1686_v7 }
 0x6cc   : > { %v1681_v13 = vpop.xlane.xlu1 %1680 }
 0x6cd   : > { %v1688_v14 = vsub.f32 %v1670_v41, %v1684_v12  ;;  %v1685_v15 = vmul.f32 0.0078125, %v1681_v13  ;;  %1694 = vadd.xlane.f32.xlu0 %v1690_v44  ;;  %v1691_v45 = vmul.f32 %v1687_v10, %v1687_v10 }
 0x6cf   : > { %v1689_v16 = vsub.f32 %v1671_v62, %v1685_v15  ;;  %1696 = vadd.xlane.f32.xlu1 %v1691_v45  ;;  %v1692_v49 = vmul.f32 %v1688_v14, %v1688_v14 }
 0x6d1   : > { %1698 = vadd.xlane.f32.xlu0 %v1692_v49  ;;  %v1693_v50 = vmul.f32 %v1689_v16, %v1689_v16 }
 0x6d3   : > { %1700 = vadd.xlane.f32.xlu1 %v1693_v50 }
 0x75a   : > { %v1695_v17 = vpop.xlane.xlu0 %1694 }
 0x75b   : > { %v1702_v18 = vmul.f32 0.0078125, %v1695_v17 }
 0x75c   : > { %v1697_v19 = vpop.xlane.xlu1 %1696 }
 0x75d   : > { %v1706_v21 = vadd.f32 1e-05, %v1702_v18  ;;  %v1703_v22 = vmul.f32 0.0078125, %v1697_v19 }
 0x75e   : > { %v1699_v24 = vpop.xlane.xlu0 %1698 }
 0x75f   : > { %2358 = vrsqrt.f32 %v1706_v21  ;;  %v1707_v25 = vadd.f32 1e-05, %v1703_v22  ;;  %v1704_v26 = vmul.f32 0.0078125, %v1699_v24 }
 0x760   : > { %v1701_v27 = vpop.xlane.xlu1 %1700 }
 0x761   : > { %2360 = vrsqrt.f32 %v1707_v25  ;;  %v1708_v28 = vadd.f32 1e-05, %v1704_v26  ;;  %v1705_v30 = vmul.f32 0.0078125, %v1701_v27 }
 0x763   : > { %2362 = vrsqrt.f32 %v1708_v28  ;;  %v1709_v20 = vadd.f32 1e-05, %v1705_v30 }
 0x765   : > { %2364 = vrsqrt.f32 %v1709_v20 }
 0x769   : > { %v2359_v32 = vpop.eup %2358 }
 0x76a   : > { %v1714_v23 = vmul.f32 %v2359_v32, %v1686_v7 }
 0x76b   : > { %v2361_v34 = vpop.eup %2360 }
 0x76c   : > { %v1724_v35 = vmul.f32 %v1951_v33, %v1714_v23  ;;  %v1715_v36 = vmul.f32 %v2361_v34, %v1687_v10 }
 0x76d   : > { %v2363_v38 = vpop.eup %2362 }
 0x76e   : > { %v1725_v40 = vmul.f32 %v1951_v33, %v1715_v36  ;;  %v1716_v42 = vmul.f32 %v2363_v38, %v1688_v14  ;;  %v1734_v43 = vadd.f32 %v1952_v29, %v1724_v35 }
 0x76f   : > { %v2365_v37 = vpop.eup %2364 }
 0x770   : > { %v1735_v63 = vadd.f32 %v1952_v29, %v1725_v40  ;;  %v1726_v46 = vmul.f32 %v1951_v33, %v1716_v42  ;;  %v1717_v47 = vmul.f32 %v2365_v37, %v1689_v16 }
 0x772   : > { %v1973_v1 = vpack.c.bf16 %v1735_v63, %v1734_v43  ;;  %v1727_v48 = vmul.f32 %v1951_v33, %v1717_v47  ;;  %v1736_v51 = vadd.f32 %v1952_v29, %v1726_v46  ;;  %1765 = sbr.rel (!%p2498_p5) target bundleno = 1921 (0x781), region = 121 }
 0x774   : > { %1974 = vst [vmem:[%s515_s23] sm:$0xff] %v1973_v1   ;;  %v1737_v52 = vadd.f32 %v1952_v29, %v1727_v48 }
 0x776   : > { %v1978_v53 = vpack.c.bf16 %v1737_v52, %v1736_v51 }
 0x778   : > { %1980 = vst [vmem:[%s515_s23 + $0x8] sm:$0xff] %v1978_v53  }
 0x77b   : > { %v1784_v4 = vld [vmem:[%s515_s23] sm:$0xff]  }
 0x77c   : > { %1785 = vst [vmem:[%s1768_s26] sm:$0xff] %v1784_v4  }
 0x77f   : > { %v1788_v54 = vld [vmem:[%s515_s23 + $0x8] sm:$0xff]  }
 0x780   : > { %1789 = vst [vmem:[%s1768_s26 + $0x10] sm:$0xff] %v1788_v54  }
 0x781 PF: > { %p21_p10 = scmp.ge.s32.totalorder %s2485_s17, 4   ;;  %s2918_s29 = smov %s2384_s30 }
 0x782   : > { %s2919_s30 = smov %s2496_s20  ;;  %s2920_s15 = smov %s2485_s17 }
 0x783   :  { %23 = sbr.rel (!%p21_p10) target bundleno = 2 (0x2), region = 195 }

</bundles_post_ra>
